<compile_context>
chip_gen: v5e
topology: v5e:2x2
jax: 0.10.0
libtpu: 0.0.40
codegen_flags: <defaults>
</compile_context>

<pallas_src>
import jax
import jax.numpy as jnp
from jax import lax
from jax.experimental import pallas as pl
from jax.experimental.pallas import tpu as pltpu


HPARAMS = dict(
    nb_hidden_layers=2,      # in_layer + 1 hidden GATConv
    size_hidden_layers=8,
    heads=2,
    out_heads=1,
    bn_bool=True,
    dropout_gat=0.6,         # eval mode -> identity (not applied)
    encoder=[5, 16],         # encoder: Linear(5 -> 16)
    decoder=[4, 3],          # decoder: Linear(4 -> 3); out_layer outputs 4
)

_DN = (((1,), (1,)), ((), ()))   # dot_general: contract last dim of both operands
_NEG = -1e30


# ------------------------- fused per-graph kernel -------------------------

def _make_forward_kernel(hp):
    H = hp['heads']
    C = hp['size_hidden_layers']
    n_gat = hp['nb_hidden_layers']
    bn_bool = hp['bn_bool']

    def kernel(*refs):
        it = iter(refs)
        x_ref, adj_ref, rep_ref, e_sel_ref, hm_ref = (next(it) for _ in range(5))
        enc_w, enc_b = next(it), next(it)
        gat_refs = [tuple(next(it) for _ in range(6)) for _ in range(n_gat)]
        ow, oad, oas, ob = (next(it) for _ in range(4))
        dec_w, dec_b = next(it), next(it)
        o_ref = next(it)

        # ---- per-graph adjacency masks (computed once, reused by every layer) ----
        adj_b = adj_ref[0]                                    # [N, N] bf16 0/1, edge j->i
        rep = rep_ref[...]                                    # [N, H*N] bf16, tiled identity
        e_sel = e_sel_ref[...]                                # [H, H*N] f32 head selector
        hm = hm_ref[...]                                      # [H, H*C] f32 head mask

        adj_f = adj_b.astype(jnp.float32)
        adj_neg = jnp.where(adj_f > 0, 0.0, _NEG)             # [N, N] (out layer)
        adj_p = jnp.dot(adj_b, rep, preferred_element_type=jnp.float32)   # [N, H*N]
        adj_neg_p = jnp.where(adj_p > 0, 0.0, _NEG)           # lane-packed mask

        # ---- encoder ----
        z = jnp.dot(x_ref[0], enc_w[...],
                    preferred_element_type=jnp.float32) + enc_b[...]

        # ---- in_layer + hidden GATConv layers (concat=True) + BN + ReLU ----
        for (w, a_dst_big, a_src_flat, bias, gamma, beta) in gat_refs:
            xp = jnp.dot(z, w[...], preferred_element_type=jnp.float32)   # [N, H*C]
            # block-diagonal stacked features: xpb[h*N+j, :] = xp[j, :] masked to head h
            xpb = jnp.concatenate([xp * hm[h:h + 1, :] for h in range(H)], axis=0)
            # lane-packed logits: head h lives in lanes h*N .. (h+1)*N-1
            dst = jnp.dot(xp, a_dst_big[...],
                          preferred_element_type=jnp.float32)             # [N, H*N]
            src = lax.dot_general(a_src_flat[...], xpb, _DN,
                                  preferred_element_type=jnp.float32)     # [1, H*N]
            e = dst + src
            e = jnp.where(e > 0, e, 0.2 * e)                              # LeakyReLU(0.2)
            e = e + adj_neg_p                                             # mask non-edges
            m = jnp.max(e, axis=-1, keepdims=True)                        # shared shift (valid)
            p = jnp.exp(e - m)                                            # non-edges -> 0
            den = lax.dot_general(p, e_sel, _DN,
                                  preferred_element_type=jnp.float32)     # [N, H] per-head sums
            inv = pl.reciprocal(jnp.maximum(den, 1e-20), approx=True)     # EUP, not VALU divide
            raw = jnp.dot(p, xpb, preferred_element_type=jnp.float32)     # [N, H*C] concat layout
            # normalize on the small tile (per-node, per-head), add GATConv bias
            z = raw * jnp.dot(inv, hm, preferred_element_type=jnp.float32) + bias[...]
            # TODO(synk): attention dropout (p=0.6) is training-only; eval = identity.
            if bn_bool:
                mean = jnp.mean(z, axis=0, keepdims=True)
                var = jnp.mean((z - mean) ** 2, axis=0, keepdims=True)
                z = (z - mean) * lax.rsqrt(var + 1e-5) * gamma[...] + beta[...]
            z = jnp.maximum(z, 0.0)                                       # ReLU

        # ---- out_layer (heads=1, concat=False -> mean over 1 head = identity) ----
        xp = jnp.dot(z, ow[...], preferred_element_type=jnp.float32)      # [N, dec_in]
        d = lax.dot_general(xp, oad[...], _DN,
                            preferred_element_type=jnp.float32)           # [N, 1]
        s = lax.dot_general(oas[...], xp, _DN,
                            preferred_element_type=jnp.float32)           # [1, N]
        e = d + s
        e = jnp.where(e > 0, e, 0.2 * e)
        e = e + adj_neg
        m = jnp.max(e, axis=-1, keepdims=True)
        p = jnp.exp(e - m)
        den = jnp.maximum(jnp.sum(p, axis=-1, keepdims=True), 1e-20)
        inv = pl.reciprocal(den, approx=True)   # use approx=False if strict PyG parity needed
        z = jnp.dot(p, xp, preferred_element_type=jnp.float32) * inv + ob[...]

        # ---- decoder ----
        o_ref[0] = jnp.dot(z, dec_w[...],
                           preferred_element_type=jnp.float32) + dec_b[...]

    return kernel


# ------------------------- wrapper -------------------------

def gat_forward(params, x, adj, hp):
    """Batched whole-network forward: one pallas_call, grid over graphs."""
    B, N, _ = x.shape
    H, C = hp['heads'], hp['size_hidden_layers']
    dec_out = hp['decoder'][1]
    assert hp['out_heads'] == 1, "kernel assumes out_heads == 1 (mean over 1 head)"

    f32 = jnp.float32
    # Selector / packing constants (tiny, VMEM-resident across the whole grid).
    e_sel = jnp.kron(jnp.eye(H, dtype=f32), jnp.ones((1, N), f32))        # [H, H*N]
    head_mask = jnp.kron(jnp.eye(H, dtype=f32), jnp.ones((1, C), f32))    # [H, H*C]
    rep = jnp.kron(jnp.ones((1, H), f32), jnp.eye(N, dtype=f32)).astype(jnp.bfloat16)  # [N, H*N]

    flat = [x, adj.astype(jnp.bfloat16), rep, e_sel, head_mask,
            params['enc_w'], params['enc_b']]
    for i, layer in enumerate(params['gat']):
        a_dst, a_src = layer['a_dst'], layer['a_src']                     # [H, C] each
        # a_dst_big[h*C+c, h'*N+j] = a_dst[h, c] * (h == h')  -> one matmul broadcasts
        # the per-head destination scores across that head's lane block.
        a_dst_big = (a_dst[:, :, None, None]
                     * jnp.eye(H, dtype=f32)[:, None, :, None])           # [H, C, H, 1]
        a_dst_big = jnp.broadcast_to(a_dst_big, (H, C, H, N)).reshape(H * C, H * N)
        a_src_flat = a_src.reshape(1, H * C)
        flat += [layer['W'], a_dst_big, a_src_flat, layer['bias'],
                 params['bn'][i]['gamma'], params['bn'][i]['beta']]
    ol = params['out']
    flat += [ol['W'], ol['a_dst'], ol['a_src'], ol['bias']]
    flat += [params['dec_w'], params['dec_b']]

    def batch_spec(shape):
        nrest = len(shape) - 1
        return pl.BlockSpec((1,) + tuple(shape[1:]),
                            lambda b: (b,) + (0,) * nrest)

    def const_spec(arr):
        nd = arr.ndim
        return pl.BlockSpec(tuple(arr.shape), lambda b: (0,) * nd)

    in_specs = [batch_spec(x.shape), batch_spec(adj.shape)]
    in_specs += [const_spec(a) for a in flat[2:]]

    return pl.pallas_call(
        _make_forward_kernel(hp),
        out_shape=jax.ShapeDtypeStruct((B, N, dec_out), jnp.float32),
        grid=(B,),
        in_specs=in_specs,
        out_specs=pl.BlockSpec((1, N, dec_out), lambda b: (b, 0, 0)),
        compiler_params=pltpu.CompilerParams(
            dimension_semantics=("parallel",)),
    )(*flat)


# ------------------------- params -------------------------

def init_params(key, hp):
    keys = iter(jax.random.split(key, 64))

    def nrm(shape, scale=0.1):
        return scale * jax.random.normal(next(keys), shape, dtype=jnp.float32)

    p = {}
    enc_in, enc_out = hp['encoder']
    p['enc_w'] = nrm((enc_in, enc_out))
    p['enc_b'] = nrm((1, enc_out))

    H, C = hp['heads'], hp['size_hidden_layers']
    p['gat'], p['bn'] = [], []
    in_dim = enc_out
    for _ in range(hp['nb_hidden_layers']):          # in_layer + hidden layers
        p['gat'].append(dict(
            W=nrm((in_dim, H * C)),                  # heads folded into out dim
            a_src=nrm((H, C)),
            a_dst=nrm((H, C)),
            bias=nrm((1, H * C)),
        ))
        p['bn'].append(dict(gamma=jnp.ones((1, H * C), jnp.float32),
                            beta=jnp.zeros((1, H * C), jnp.float32)))
        in_dim = H * C

    OH, dec_in = hp['out_heads'], hp['decoder'][0]
    p['out'] = dict(
        W=nrm((in_dim, OH * dec_in)),
        a_src=nrm((OH, dec_in)),
        a_dst=nrm((OH, dec_in)),
        bias=nrm((1, dec_in)),
    )

    dec_out = hp['decoder'][1]
    p['dec_w'] = nrm((dec_in, dec_out))
    p['dec_b'] = nrm((1, dec_out))
    return p


# ------------------------- demo -------------------------

if __name__ == "__main__":
    key = jax.random.PRNGKey(0)
    k_x, k_adj, k_p = jax.random.split(key, 3)

    B, N = 8, 64
    F_in = HPARAMS['encoder'][0]
    x = jax.random.normal(k_x, (B, N, F_in), dtype=jnp.float32)

    # random directed graphs (~20% density) + self-loops; adj[b, i, j] = edge j -> i
    # (self-loops guarantee every softmax row has at least one edge)
    adj = jax.random.bernoulli(k_adj, 0.2, (B, N, N)).astype(jnp.float32)
    adj = jnp.maximum(adj, jnp.eye(N, dtype=jnp.float32)[None])

    params = init_params(k_p, HPARAMS)

    fwd = jax.jit(lambda p, xx, aa: gat_forward(p, xx, aa, HPARAMS))
    out = jax.block_until_ready(fwd(params, x, adj))

    assert out.shape == (B, N, HPARAMS['decoder'][1]), out.shape
    assert bool(jnp.all(jnp.isfinite(out)))
    print("KERNEL_OK")
</pallas_src>

<mosaic_0001>
module attributes {stable_mosaic.version = 11 : i64} {
  func.func @kernel(%arg0: i32, %arg1: memref<1x64x5xf32, #tpu.memory_space<vmem>>, %arg2: memref<1x64x64xbf16, #tpu.memory_space<vmem>>, %arg3: memref<64x128xbf16, #tpu.memory_space<vmem>>, %arg4: memref<2x128xf32, #tpu.memory_space<vmem>>, %arg5: memref<2x16xf32, #tpu.memory_space<vmem>>, %arg6: memref<5x16xf32, #tpu.memory_space<vmem>>, %arg7: memref<1x16xf32, #tpu.memory_space<vmem>>, %arg8: memref<16x16xf32, #tpu.memory_space<vmem>>, %arg9: memref<16x128xf32, #tpu.memory_space<vmem>>, %arg10: memref<1x16xf32, #tpu.memory_space<vmem>>, %arg11: memref<1x16xf32, #tpu.memory_space<vmem>>, %arg12: memref<1x16xf32, #tpu.memory_space<vmem>>, %arg13: memref<1x16xf32, #tpu.memory_space<vmem>>, %arg14: memref<16x16xf32, #tpu.memory_space<vmem>>, %arg15: memref<16x128xf32, #tpu.memory_space<vmem>>, %arg16: memref<1x16xf32, #tpu.memory_space<vmem>>, %arg17: memref<1x16xf32, #tpu.memory_space<vmem>>, %arg18: memref<1x16xf32, #tpu.memory_space<vmem>>, %arg19: memref<1x16xf32, #tpu.memory_space<vmem>>, %arg20: memref<16x4xf32, #tpu.memory_space<vmem>>, %arg21: memref<1x4xf32, #tpu.memory_space<vmem>>, %arg22: memref<1x4xf32, #tpu.memory_space<vmem>>, %arg23: memref<1x4xf32, #tpu.memory_space<vmem>>, %arg24: memref<4x3xf32, #tpu.memory_space<vmem>>, %arg25: memref<1x3xf32, #tpu.memory_space<vmem>>, %arg26: memref<1x64x3xf32, #tpu.memory_space<vmem>>) attributes {dimension_semantics = [#tpu.dimension_semantics<parallel>], iteration_bounds = array<i64: 8>, scalar_prefetch = 0 : i64, scratch_operands = 0 : i64, tpu.core_type = #tpu.core_type<tc>, window_params = [{transform_indices = @transform_0, window_bounds = array<i64: 1, 64, 5>}, {transform_indices = @transform_1, window_bounds = array<i64: 1, 64, 64>}, {pipeline_mode = #tpu.pipeline_mode<synchronous>, transform_indices = @transform_2, window_bounds = array<i64: 64, 128>}, {pipeline_mode = #tpu.pipeline_mode<synchronous>, transform_indices = @transform_3, window_bounds = array<i64: 2, 128>}, {pipeline_mode = #tpu.pipeline_mode<synchronous>, transform_indices = @transform_4, window_bounds = array<i64: 2, 16>}, {pipeline_mode = #tpu.pipeline_mode<synchronous>, transform_indices = @transform_5, window_bounds = array<i64: 5, 16>}, {pipeline_mode = #tpu.pipeline_mode<synchronous>, transform_indices = @transform_6, window_bounds = array<i64: 1, 16>}, {pipeline_mode = #tpu.pipeline_mode<synchronous>, transform_indices = @transform_7, window_bounds = array<i64: 16, 16>}, {pipeline_mode = #tpu.pipeline_mode<synchronous>, transform_indices = @transform_8, window_bounds = array<i64: 16, 128>}, {pipeline_mode = #tpu.pipeline_mode<synchronous>, transform_indices = @transform_9, window_bounds = array<i64: 1, 16>}, {pipeline_mode = #tpu.pipeline_mode<synchronous>, transform_indices = @transform_10, window_bounds = array<i64: 1, 16>}, {pipeline_mode = #tpu.pipeline_mode<synchronous>, transform_indices = @transform_11, window_bounds = array<i64: 1, 16>}, {pipeline_mode = #tpu.pipeline_mode<synchronous>, transform_indices = @transform_12, window_bounds = array<i64: 1, 16>}, {pipeline_mode = #tpu.pipeline_mode<synchronous>, transform_indices = @transform_13, window_bounds = array<i64: 16, 16>}, {pipeline_mode = #tpu.pipeline_mode<synchronous>, transform_indices = @transform_14, window_bounds = array<i64: 16, 128>}, {pipeline_mode = #tpu.pipeline_mode<synchronous>, transform_indices = @transform_15, window_bounds = array<i64: 1, 16>}, {pipeline_mode = #tpu.pipeline_mode<synchronous>, transform_indices = @transform_16, window_bounds = array<i64: 1, 16>}, {pipeline_mode = #tpu.pipeline_mode<synchronous>, transform_indices = @transform_17, window_bounds = array<i64: 1, 16>}, {pipeline_mode = #tpu.pipeline_mode<synchronous>, transform_indices = @transform_18, window_bounds = array<i64: 1, 16>}, {pipeline_mode = #tpu.pipeline_mode<synchronous>, transform_indices = @transform_19, window_bounds = array<i64: 16, 4>}, {pipeline_mode = #tpu.pipeline_mode<synchronous>, transform_indices = @transform_20, window_bounds = array<i64: 1, 4>}, {pipeline_mode = #tpu.pipeline_mode<synchronous>, transform_indices = @transform_21, window_bounds = array<i64: 1, 4>}, {pipeline_mode = #tpu.pipeline_mode<synchronous>, transform_indices = @transform_22, window_bounds = array<i64: 1, 4>}, {pipeline_mode = #tpu.pipeline_mode<synchronous>, transform_indices = @transform_23, window_bounds = array<i64: 4, 3>}, {pipeline_mode = #tpu.pipeline_mode<synchronous>, transform_indices = @transform_24, window_bounds = array<i64: 1, 3>}, {transform_indices = @transform_25, window_bounds = array<i64: 1, 64, 3>}]} {
    %c0 = arith.constant 0 : index
    %c0_0 = arith.constant 0 : index
    %c0_1 = arith.constant 0 : index
    %0 = vector.load %arg2[%c0, %c0_0, %c0_1] : memref<1x64x64xbf16, #tpu.memory_space<vmem>>, vector<1x64x64xbf16>
    %1 = vector.shape_cast %0 : vector<1x64x64xbf16> to vector<64x64xbf16>
    %c0_2 = arith.constant 0 : index
    %c0_3 = arith.constant 0 : index
    %2 = vector.load %arg3[%c0_2, %c0_3] : memref<64x128xbf16, #tpu.memory_space<vmem>>, vector<64x128xbf16>
    %c0_4 = arith.constant 0 : index
    %c0_5 = arith.constant 0 : index
    %3 = vector.load %arg4[%c0_4, %c0_5] : memref<2x128xf32, #tpu.memory_space<vmem>>, vector<2x128xf32>
    %c0_6 = arith.constant 0 : index
    %c0_7 = arith.constant 0 : index
    %4 = vector.load %arg5[%c0_6, %c0_7] : memref<2x16xf32, #tpu.memory_space<vmem>>, vector<2x16xf32>
    %5 = arith.extf %1 : vector<64x64xbf16> to vector<64x64xf32>
    %cst = arith.constant 0.000000e+00 : f32
    %6 = vector.broadcast %cst : f32 to vector<64x64xf32>
    %7 = arith.cmpf ogt, %5, %6 : vector<64x64xf32>
    %cst_8 = arith.constant 0.000000e+00 : f32
    %cst_9 = arith.constant -1.000000e+30 : f32
    %8 = vector.broadcast %cst_8 : f32 to vector<64x64xf32>
    %9 = vector.broadcast %cst_9 : f32 to vector<64x64xf32>
    %10 = arith.select %7, %8, %9 : vector<64x64xi1>, vector<64x64xf32>
    %cst_10 = arith.constant dense<0.000000e+00> : vector<64x128xf32>
    %11 = tpu.matmul %1, %2, %cst_10 {dimension_numbers = #tpu.dot_dimension_numbers<[1], [0], [0], [1], [0, 0, 1, 1], [], []>} : vector<64x64xbf16>, vector<64x128xbf16>, vector<64x128xf32> -> vector<64x128xf32>
    %cst_11 = arith.constant 0.000000e+00 : f32
    %12 = vector.broadcast %cst_11 : f32 to vector<64x128xf32>
    %13 = arith.cmpf ogt, %11, %12 : vector<64x128xf32>
    %cst_12 = arith.constant 0.000000e+00 : f32
    %cst_13 = arith.constant -1.000000e+30 : f32
    %14 = vector.broadcast %cst_12 : f32 to vector<64x128xf32>
    %15 = vector.broadcast %cst_13 : f32 to vector<64x128xf32>
    %16 = arith.select %13, %14, %15 : vector<64x128xi1>, vector<64x128xf32>
    %c0_14 = arith.constant 0 : index
    %c0_15 = arith.constant 0 : index
    %c0_16 = arith.constant 0 : index
    %17 = vector.load %arg1[%c0_14, %c0_15, %c0_16] : memref<1x64x5xf32, #tpu.memory_space<vmem>>, vector<1x64x5xf32>
    %18 = vector.shape_cast %17 : vector<1x64x5xf32> to vector<64x5xf32>
    %c0_17 = arith.constant 0 : index
    %c0_18 = arith.constant 0 : index
    %19 = vector.load %arg6[%c0_17, %c0_18] : memref<5x16xf32, #tpu.memory_space<vmem>>, vector<5x16xf32>
    %cst_19 = arith.constant dense<0.000000e+00> : vector<64x16xf32>
    %20 = tpu.matmul %18, %19, %cst_19 {dimension_numbers = #tpu.dot_dimension_numbers<[1], [0], [0], [1], [0, 0, 1, 1], [], []>} : vector<64x5xf32>, vector<5x16xf32>, vector<64x16xf32> -> vector<64x16xf32>
    %c0_20 = arith.constant 0 : index
    %c0_21 = arith.constant 0 : index
    %21 = vector.load %arg7[%c0_20, %c0_21] : memref<1x16xf32, #tpu.memory_space<vmem>>, vector<1x16xf32>
    %22 = vector.broadcast %21 : vector<1x16xf32> to vector<64x16xf32>
    %23 = arith.addf %20, %22 : vector<64x16xf32>
    %c0_22 = arith.constant 0 : index
    %c0_23 = arith.constant 0 : index
    %24 = vector.load %arg8[%c0_22, %c0_23] : memref<16x16xf32, #tpu.memory_space<vmem>>, vector<16x16xf32>
    %cst_24 = arith.constant dense<0.000000e+00> : vector<64x16xf32>
    %25 = tpu.matmul %23, %24, %cst_24 {dimension_numbers = #tpu.dot_dimension_numbers<[1], [0], [0], [1], [0, 0, 1, 1], [], []>} : vector<64x16xf32>, vector<16x16xf32>, vector<64x16xf32> -> vector<64x16xf32>
    %26 = vector.extract_strided_slice %4 {offsets = [0, 0], sizes = [1, 16], strides = [1, 1]} : vector<2x16xf32> to vector<1x16xf32>
    %27 = vector.broadcast %26 : vector<1x16xf32> to vector<64x16xf32>
    %28 = arith.mulf %25, %27 : vector<64x16xf32>
    %29 = vector.extract_strided_slice %4 {offsets = [1, 0], sizes = [1, 16], strides = [1, 1]} : vector<2x16xf32> to vector<1x16xf32>
    %30 = vector.broadcast %29 : vector<1x16xf32> to vector<64x16xf32>
    %31 = arith.mulf %25, %30 : vector<64x16xf32>
    %32 = tpu.concatenate %28, %31 in 0 : vector<64x16xf32>, vector<64x16xf32> -> vector<128x16xf32>
    %c0_25 = arith.constant 0 : index
    %c0_26 = arith.constant 0 : index
    %33 = vector.load %arg9[%c0_25, %c0_26] : memref<16x128xf32, #tpu.memory_space<vmem>>, vector<16x128xf32>
    %cst_27 = arith.constant dense<0.000000e+00> : vector<64x128xf32>
    %34 = tpu.matmul %25, %33, %cst_27 {dimension_numbers = #tpu.dot_dimension_numbers<[1], [0], [0], [1], [0, 0, 1, 1], [], []>} : vector<64x16xf32>, vector<16x128xf32>, vector<64x128xf32> -> vector<64x128xf32>
    %c0_28 = arith.constant 0 : index
    %c0_29 = arith.constant 0 : index
    %35 = vector.load %arg10[%c0_28, %c0_29] : memref<1x16xf32, #tpu.memory_space<vmem>>, vector<1x16xf32>
    %cst_30 = arith.constant dense<0.000000e+00> : vector<1x128xf32>
    %36 = tpu.matmul %35, %32, %cst_30 {dimension_numbers = #tpu.dot_dimension_numbers<[1], [1], [0], [0], [0, 0, 1, 0], [], []>} : vector<1x16xf32>, vector<128x16xf32>, vector<1x128xf32> -> vector<1x128xf32>
    %37 = vector.broadcast %36 : vector<1x128xf32> to vector<64x128xf32>
    %38 = arith.addf %34, %37 : vector<64x128xf32>
    %cst_31 = arith.constant 0.000000e+00 : f32
    %39 = vector.broadcast %cst_31 : f32 to vector<64x128xf32>
    %40 = arith.cmpf ogt, %38, %39 : vector<64x128xf32>
    %cst_32 = arith.constant 2.000000e-01 : f32
    %41 = vector.broadcast %cst_32 : f32 to vector<64x128xf32>
    %42 = arith.mulf %41, %38 : vector<64x128xf32>
    %43 = arith.select %40, %38, %42 : vector<64x128xi1>, vector<64x128xf32>
    %44 = arith.addf %43, %16 : vector<64x128xf32>
    %cst_33 = arith.constant dense<0xFF800000> : vector<64xf32>
    %45 = vector.multi_reduction <maximumf>, %44, %cst_33 [1] : vector<64x128xf32> to vector<64xf32>
    %46 = vector.shape_cast %45 : vector<64xf32> to vector<64x1xf32>
    %47 = vector.broadcast %46 : vector<64x1xf32> to vector<64x128xf32>
    %48 = arith.subf %44, %47 : vector<64x128xf32>
    %49 = math.exp %48 : vector<64x128xf32>
    %cst_34 = arith.constant dense<0.000000e+00> : vector<64x2xf32>
    %50 = tpu.matmul %49, %3, %cst_34 {dimension_numbers = #tpu.dot_dimension_numbers<[1], [1], [0], [0], [0, 0, 1, 0], [], []>} : vector<64x128xf32>, vector<2x128xf32>, vector<64x2xf32> -> vector<64x2xf32>
    %cst_35 = arith.constant 9.99999968E-21 : f32
    %51 = vector.broadcast %cst_35 : f32 to vector<64x2xf32>
    %52 = arith.maximumf %50, %51 : vector<64x2xf32>
    %53 = tpu.reciprocal %52 {approx = true} : vector<64x2xf32> -> vector<64x2xf32>
    %cst_36 = arith.constant dense<0.000000e+00> : vector<64x16xf32>
    %54 = tpu.matmul %49, %32, %cst_36 {dimension_numbers = #tpu.dot_dimension_numbers<[1], [0], [0], [1], [0, 0, 1, 1], [], []>} : vector<64x128xf32>, vector<128x16xf32>, vector<64x16xf32> -> vector<64x16xf32>
    %cst_37 = arith.constant dense<0.000000e+00> : vector<64x16xf32>
    %55 = tpu.matmul %53, %4, %cst_37 {dimension_numbers = #tpu.dot_dimension_numbers<[1], [0], [0], [1], [0, 0, 1, 1], [], []>} : vector<64x2xf32>, vector<2x16xf32>, vector<64x16xf32> -> vector<64x16xf32>
    %56 = arith.mulf %54, %55 : vector<64x16xf32>
    %c0_38 = arith.constant 0 : index
    %c0_39 = arith.constant 0 : index
    %57 = vector.load %arg11[%c0_38, %c0_39] : memref<1x16xf32, #tpu.memory_space<vmem>>, vector<1x16xf32>
    %58 = vector.broadcast %57 : vector<1x16xf32> to vector<64x16xf32>
    %59 = arith.addf %56, %58 : vector<64x16xf32>
    %cst_40 = arith.constant dense<0.000000e+00> : vector<16xf32>
    %60 = vector.multi_reduction <add>, %59, %cst_40 [0] : vector<64x16xf32> to vector<16xf32>
    %61 = vector.shape_cast %60 : vector<16xf32> to vector<1x16xf32>
    %cst_41 = arith.constant 6.400000e+01 : f32
    %62 = vector.broadcast %cst_41 : f32 to vector<1x16xf32>
    %63 = arith.divf %61, %62 : vector<1x16xf32>
    %64 = vector.broadcast %63 : vector<1x16xf32> to vector<64x16xf32>
    %65 = arith.subf %59, %64 : vector<64x16xf32>
    %66 = arith.mulf %65, %65 : vector<64x16xf32>
    %cst_42 = arith.constant dense<0.000000e+00> : vector<16xf32>
    %67 = vector.multi_reduction <add>, %66, %cst_42 [0] : vector<64x16xf32> to vector<16xf32>
    %68 = vector.shape_cast %67 : vector<16xf32> to vector<1x16xf32>
    %cst_43 = arith.constant 6.400000e+01 : f32
    %69 = vector.broadcast %cst_43 : f32 to vector<1x16xf32>
    %70 = arith.divf %68, %69 : vector<1x16xf32>
    %71 = vector.broadcast %63 : vector<1x16xf32> to vector<64x16xf32>
    %72 = arith.subf %59, %71 : vector<64x16xf32>
    %cst_44 = arith.constant 9.99999974E-6 : f32
    %73 = vector.broadcast %cst_44 : f32 to vector<1x16xf32>
    %74 = arith.addf %70, %73 : vector<1x16xf32>
    %75 = math.rsqrt %74 : vector<1x16xf32>
    %76 = vector.broadcast %75 : vector<1x16xf32> to vector<64x16xf32>
    %77 = arith.mulf %72, %76 : vector<64x16xf32>
    %c0_45 = arith.constant 0 : index
    %c0_46 = arith.constant 0 : index
    %78 = vector.load %arg12[%c0_45, %c0_46] : memref<1x16xf32, #tpu.memory_space<vmem>>, vector<1x16xf32>
    %79 = vector.broadcast %78 : vector<1x16xf32> to vector<64x16xf32>
    %80 = arith.mulf %77, %79 : vector<64x16xf32>
    %c0_47 = arith.constant 0 : index
    %c0_48 = arith.constant 0 : index
    %81 = vector.load %arg13[%c0_47, %c0_48] : memref<1x16xf32, #tpu.memory_space<vmem>>, vector<1x16xf32>
    %82 = vector.broadcast %81 : vector<1x16xf32> to vector<64x16xf32>
    %83 = arith.addf %80, %82 : vector<64x16xf32>
    %cst_49 = arith.constant 0.000000e+00 : f32
    %84 = vector.broadcast %cst_49 : f32 to vector<64x16xf32>
    %85 = arith.maximumf %83, %84 : vector<64x16xf32>
    %c0_50 = arith.constant 0 : index
    %c0_51 = arith.constant 0 : index
    %86 = vector.load %arg14[%c0_50, %c0_51] : memref<16x16xf32, #tpu.memory_space<vmem>>, vector<16x16xf32>
    %cst_52 = arith.constant dense<0.000000e+00> : vector<64x16xf32>
    %87 = tpu.matmul %85, %86, %cst_52 {dimension_numbers = #tpu.dot_dimension_numbers<[1], [0], [0], [1], [0, 0, 1, 1], [], []>} : vector<64x16xf32>, vector<16x16xf32>, vector<64x16xf32> -> vector<64x16xf32>
    %88 = vector.extract_strided_slice %4 {offsets = [0, 0], sizes = [1, 16], strides = [1, 1]} : vector<2x16xf32> to vector<1x16xf32>
    %89 = vector.broadcast %88 : vector<1x16xf32> to vector<64x16xf32>
    %90 = arith.mulf %87, %89 : vector<64x16xf32>
    %91 = vector.extract_strided_slice %4 {offsets = [1, 0], sizes = [1, 16], strides = [1, 1]} : vector<2x16xf32> to vector<1x16xf32>
    %92 = vector.broadcast %91 : vector<1x16xf32> to vector<64x16xf32>
    %93 = arith.mulf %87, %92 : vector<64x16xf32>
    %94 = tpu.concatenate %90, %93 in 0 : vector<64x16xf32>, vector<64x16xf32> -> vector<128x16xf32>
    %c0_53 = arith.constant 0 : index
    %c0_54 = arith.constant 0 : index
    %95 = vector.load %arg15[%c0_53, %c0_54] : memref<16x128xf32, #tpu.memory_space<vmem>>, vector<16x128xf32>
    %cst_55 = arith.constant dense<0.000000e+00> : vector<64x128xf32>
    %96 = tpu.matmul %87, %95, %cst_55 {dimension_numbers = #tpu.dot_dimension_numbers<[1], [0], [0], [1], [0, 0, 1, 1], [], []>} : vector<64x16xf32>, vector<16x128xf32>, vector<64x128xf32> -> vector<64x128xf32>
    %c0_56 = arith.constant 0 : index
    %c0_57 = arith.constant 0 : index
    %97 = vector.load %arg16[%c0_56, %c0_57] : memref<1x16xf32, #tpu.memory_space<vmem>>, vector<1x16xf32>
    %cst_58 = arith.constant dense<0.000000e+00> : vector<1x128xf32>
    %98 = tpu.matmul %97, %94, %cst_58 {dimension_numbers = #tpu.dot_dimension_numbers<[1], [1], [0], [0], [0, 0, 1, 0], [], []>} : vector<1x16xf32>, vector<128x16xf32>, vector<1x128xf32> -> vector<1x128xf32>
    %99 = vector.broadcast %98 : vector<1x128xf32> to vector<64x128xf32>
    %100 = arith.addf %96, %99 : vector<64x128xf32>
    %cst_59 = arith.constant 0.000000e+00 : f32
    %101 = vector.broadcast %cst_59 : f32 to vector<64x128xf32>
    %102 = arith.cmpf ogt, %100, %101 : vector<64x128xf32>
    %cst_60 = arith.constant 2.000000e-01 : f32
    %103 = vector.broadcast %cst_60 : f32 to vector<64x128xf32>
    %104 = arith.mulf %103, %100 : vector<64x128xf32>
    %105 = arith.select %102, %100, %104 : vector<64x128xi1>, vector<64x128xf32>
    %106 = arith.addf %105, %16 : vector<64x128xf32>
    %cst_61 = arith.constant dense<0xFF800000> : vector<64xf32>
    %107 = vector.multi_reduction <maximumf>, %106, %cst_61 [1] : vector<64x128xf32> to vector<64xf32>
    %108 = vector.shape_cast %107 : vector<64xf32> to vector<64x1xf32>
    %109 = vector.broadcast %108 : vector<64x1xf32> to vector<64x128xf32>
    %110 = arith.subf %106, %109 : vector<64x128xf32>
    %111 = math.exp %110 : vector<64x128xf32>
    %cst_62 = arith.constant dense<0.000000e+00> : vector<64x2xf32>
    %112 = tpu.matmul %111, %3, %cst_62 {dimension_numbers = #tpu.dot_dimension_numbers<[1], [1], [0], [0], [0, 0, 1, 0], [], []>} : vector<64x128xf32>, vector<2x128xf32>, vector<64x2xf32> -> vector<64x2xf32>
    %cst_63 = arith.constant 9.99999968E-21 : f32
    %113 = vector.broadcast %cst_63 : f32 to vector<64x2xf32>
    %114 = arith.maximumf %112, %113 : vector<64x2xf32>
    %115 = tpu.reciprocal %114 {approx = true} : vector<64x2xf32> -> vector<64x2xf32>
    %cst_64 = arith.constant dense<0.000000e+00> : vector<64x16xf32>
    %116 = tpu.matmul %111, %94, %cst_64 {dimension_numbers = #tpu.dot_dimension_numbers<[1], [0], [0], [1], [0, 0, 1, 1], [], []>} : vector<64x128xf32>, vector<128x16xf32>, vector<64x16xf32> -> vector<64x16xf32>
    %cst_65 = arith.constant dense<0.000000e+00> : vector<64x16xf32>
    %117 = tpu.matmul %115, %4, %cst_65 {dimension_numbers = #tpu.dot_dimension_numbers<[1], [0], [0], [1], [0, 0, 1, 1], [], []>} : vector<64x2xf32>, vector<2x16xf32>, vector<64x16xf32> -> vector<64x16xf32>
    %118 = arith.mulf %116, %117 : vector<64x16xf32>
    %c0_66 = arith.constant 0 : index
    %c0_67 = arith.constant 0 : index
    %119 = vector.load %arg17[%c0_66, %c0_67] : memref<1x16xf32, #tpu.memory_space<vmem>>, vector<1x16xf32>
    %120 = vector.broadcast %119 : vector<1x16xf32> to vector<64x16xf32>
    %121 = arith.addf %118, %120 : vector<64x16xf32>
    %cst_68 = arith.constant dense<0.000000e+00> : vector<16xf32>
    %122 = vector.multi_reduction <add>, %121, %cst_68 [0] : vector<64x16xf32> to vector<16xf32>
    %123 = vector.shape_cast %122 : vector<16xf32> to vector<1x16xf32>
    %cst_69 = arith.constant 6.400000e+01 : f32
    %124 = vector.broadcast %cst_69 : f32 to vector<1x16xf32>
    %125 = arith.divf %123, %124 : vector<1x16xf32>
    %126 = vector.broadcast %125 : vector<1x16xf32> to vector<64x16xf32>
    %127 = arith.subf %121, %126 : vector<64x16xf32>
    %128 = arith.mulf %127, %127 : vector<64x16xf32>
    %cst_70 = arith.constant dense<0.000000e+00> : vector<16xf32>
    %129 = vector.multi_reduction <add>, %128, %cst_70 [0] : vector<64x16xf32> to vector<16xf32>
    %130 = vector.shape_cast %129 : vector<16xf32> to vector<1x16xf32>
    %cst_71 = arith.constant 6.400000e+01 : f32
    %131 = vector.broadcast %cst_71 : f32 to vector<1x16xf32>
    %132 = arith.divf %130, %131 : vector<1x16xf32>
    %133 = vector.broadcast %125 : vector<1x16xf32> to vector<64x16xf32>
    %134 = arith.subf %121, %133 : vector<64x16xf32>
    %cst_72 = arith.constant 9.99999974E-6 : f32
    %135 = vector.broadcast %cst_72 : f32 to vector<1x16xf32>
    %136 = arith.addf %132, %135 : vector<1x16xf32>
    %137 = math.rsqrt %136 : vector<1x16xf32>
    %138 = vector.broadcast %137 : vector<1x16xf32> to vector<64x16xf32>
    %139 = arith.mulf %134, %138 : vector<64x16xf32>
    %c0_73 = arith.constant 0 : index
    %c0_74 = arith.constant 0 : index
    %140 = vector.load %arg18[%c0_73, %c0_74] : memref<1x16xf32, #tpu.memory_space<vmem>>, vector<1x16xf32>
    %141 = vector.broadcast %140 : vector<1x16xf32> to vector<64x16xf32>
    %142 = arith.mulf %139, %141 : vector<64x16xf32>
    %c0_75 = arith.constant 0 : index
    %c0_76 = arith.constant 0 : index
    %143 = vector.load %arg19[%c0_75, %c0_76] : memref<1x16xf32, #tpu.memory_space<vmem>>, vector<1x16xf32>
    %144 = vector.broadcast %143 : vector<1x16xf32> to vector<64x16xf32>
    %145 = arith.addf %142, %144 : vector<64x16xf32>
    %cst_77 = arith.constant 0.000000e+00 : f32
    %146 = vector.broadcast %cst_77 : f32 to vector<64x16xf32>
    %147 = arith.maximumf %145, %146 : vector<64x16xf32>
    %c0_78 = arith.constant 0 : index
    %c0_79 = arith.constant 0 : index
    %148 = vector.load %arg20[%c0_78, %c0_79] : memref<16x4xf32, #tpu.memory_space<vmem>>, vector<16x4xf32>
    %cst_80 = arith.constant dense<0.000000e+00> : vector<64x4xf32>
    %149 = tpu.matmul %147, %148, %cst_80 {dimension_numbers = #tpu.dot_dimension_numbers<[1], [0], [0], [1], [0, 0, 1, 1], [], []>} : vector<64x16xf32>, vector<16x4xf32>, vector<64x4xf32> -> vector<64x4xf32>
    %c0_81 = arith.constant 0 : index
    %c0_82 = arith.constant 0 : index
    %150 = vector.load %arg21[%c0_81, %c0_82] : memref<1x4xf32, #tpu.memory_space<vmem>>, vector<1x4xf32>
    %cst_83 = arith.constant dense<0.000000e+00> : vector<64x1xf32>
    %151 = tpu.matmul %149, %150, %cst_83 {dimension_numbers = #tpu.dot_dimension_numbers<[1], [1], [0], [0], [0, 0, 1, 0], [], []>} : vector<64x4xf32>, vector<1x4xf32>, vector<64x1xf32> -> vector<64x1xf32>
    %c0_84 = arith.constant 0 : index
    %c0_85 = arith.constant 0 : index
    %152 = vector.load %arg22[%c0_84, %c0_85] : memref<1x4xf32, #tpu.memory_space<vmem>>, vector<1x4xf32>
    %cst_86 = arith.constant dense<0.000000e+00> : vector<1x64xf32>
    %153 = tpu.matmul %152, %149, %cst_86 {dimension_numbers = #tpu.dot_dimension_numbers<[1], [1], [0], [0], [0, 0, 1, 0], [], []>} : vector<1x4xf32>, vector<64x4xf32>, vector<1x64xf32> -> vector<1x64xf32>
    %154 = vector.broadcast %151 : vector<64x1xf32> to vector<64x64xf32>
    %155 = vector.broadcast %153 : vector<1x64xf32> to vector<64x64xf32>
    %156 = arith.addf %154, %155 : vector<64x64xf32>
    %cst_87 = arith.constant 0.000000e+00 : f32
    %157 = vector.broadcast %cst_87 : f32 to vector<64x64xf32>
    %158 = arith.cmpf ogt, %156, %157 : vector<64x64xf32>
    %cst_88 = arith.constant 2.000000e-01 : f32
    %159 = vector.broadcast %cst_88 : f32 to vector<64x64xf32>
    %160 = arith.mulf %159, %156 : vector<64x64xf32>
    %161 = arith.select %158, %156, %160 : vector<64x64xi1>, vector<64x64xf32>
    %162 = arith.addf %161, %10 : vector<64x64xf32>
    %cst_89 = arith.constant dense<0xFF800000> : vector<64xf32>
    %163 = vector.multi_reduction <maximumf>, %162, %cst_89 [1] : vector<64x64xf32> to vector<64xf32>
    %164 = vector.shape_cast %163 : vector<64xf32> to vector<64x1xf32>
    %165 = vector.broadcast %164 : vector<64x1xf32> to vector<64x64xf32>
    %166 = arith.subf %162, %165 : vector<64x64xf32>
    %167 = math.exp %166 : vector<64x64xf32>
    %cst_90 = arith.constant dense<0.000000e+00> : vector<64xf32>
    %168 = vector.multi_reduction <add>, %167, %cst_90 [1] : vector<64x64xf32> to vector<64xf32>
    %169 = vector.shape_cast %168 : vector<64xf32> to vector<64x1xf32>
    %cst_91 = arith.constant 9.99999968E-21 : f32
    %170 = vector.broadcast %cst_91 : f32 to vector<64x1xf32>
    %171 = arith.maximumf %169, %170 : vector<64x1xf32>
    %172 = tpu.reciprocal %171 {approx = true} : vector<64x1xf32> -> vector<64x1xf32>
    %cst_92 = arith.constant dense<0.000000e+00> : vector<64x4xf32>
    %173 = tpu.matmul %167, %149, %cst_92 {dimension_numbers = #tpu.dot_dimension_numbers<[1], [0], [0], [1], [0, 0, 1, 1], [], []>} : vector<64x64xf32>, vector<64x4xf32>, vector<64x4xf32> -> vector<64x4xf32>
    %174 = vector.broadcast %172 : vector<64x1xf32> to vector<64x4xf32>
    %175 = arith.mulf %173, %174 : vector<64x4xf32>
    %c0_93 = arith.constant 0 : index
    %c0_94 = arith.constant 0 : index
    %176 = vector.load %arg23[%c0_93, %c0_94] : memref<1x4xf32, #tpu.memory_space<vmem>>, vector<1x4xf32>
    %177 = vector.broadcast %176 : vector<1x4xf32> to vector<64x4xf32>
    %178 = arith.addf %175, %177 : vector<64x4xf32>
    %c0_95 = arith.constant 0 : index
    %c0_96 = arith.constant 0 : index
    %179 = vector.load %arg24[%c0_95, %c0_96] : memref<4x3xf32, #tpu.memory_space<vmem>>, vector<4x3xf32>
    %cst_97 = arith.constant dense<0.000000e+00> : vector<64x3xf32>
    %180 = tpu.matmul %178, %179, %cst_97 {dimension_numbers = #tpu.dot_dimension_numbers<[1], [0], [0], [1], [0, 0, 1, 1], [], []>} : vector<64x4xf32>, vector<4x3xf32>, vector<64x3xf32> -> vector<64x3xf32>
    %c0_98 = arith.constant 0 : index
    %c0_99 = arith.constant 0 : index
    %181 = vector.load %arg25[%c0_98, %c0_99] : memref<1x3xf32, #tpu.memory_space<vmem>>, vector<1x3xf32>
    %182 = vector.broadcast %181 : vector<1x3xf32> to vector<64x3xf32>
    %183 = arith.addf %180, %182 : vector<64x3xf32>
    %c0_100 = arith.constant 0 : index
    %c0_101 = arith.constant 0 : index
    %c0_102 = arith.constant 0 : index
    %184 = vector.load %arg26[%c0_100, %c0_101, %c0_102] : memref<1x64x3xf32, #tpu.memory_space<vmem>>, vector<1x64x3xf32>
    %185 = vector.shape_cast %184 : vector<1x64x3xf32> to vector<64x3xf32>
    %186 = vector.shape_cast %183 : vector<64x3xf32> to vector<1x64x3xf32>
    tpu.vector_store %arg26[%c0_100, %c0_101, %c0_102], %186 {strides = array<i32>} : memref<1x64x3xf32, #tpu.memory_space<vmem>>, vector<1x64x3xf32>,
    return
  }
  func.func @transform_0(%arg0: i32) -> (i32, i32, i32) {
    %c0_i32 = arith.constant 0 : i32
    %c0_i32_0 = arith.constant 0 : i32
    %c0_i32_1 = arith.constant 0 : i32
    return %arg0, %c0_i32, %c0_i32_0 : i32, i32, i32
  }
  func.func @transform_1(%arg0: i32) -> (i32, i32, i32) {
    %c0_i32 = arith.constant 0 : i32
    %c0_i32_0 = arith.constant 0 : i32
    %c0_i32_1 = arith.constant 0 : i32
    return %arg0, %c0_i32, %c0_i32_0 : i32, i32, i32
  }
  func.func @transform_2(%arg0: i32) -> (i32, i32) {
    %c0_i32 = arith.constant 0 : i32
    %c0_i32_0 = arith.constant 0 : i32
    %c0_i32_1 = arith.constant 0 : i32
    return %c0_i32, %c0_i32_0 : i32, i32
  }
  func.func @transform_3(%arg0: i32) -> (i32, i32) {
    %c0_i32 = arith.constant 0 : i32
    %c0_i32_0 = arith.constant 0 : i32
    %c0_i32_1 = arith.constant 0 : i32
    return %c0_i32, %c0_i32_0 : i32, i32
  }
  func.func @transform_4(%arg0: i32) -> (i32, i32) {
    %c0_i32 = arith.constant 0 : i32
    %c0_i32_0 = arith.constant 0 : i32
    %c0_i32_1 = arith.constant 0 : i32
    return %c0_i32, %c0_i32_0 : i32, i32
  }
  func.func @transform_5(%arg0: i32) -> (i32, i32) {
    %c0_i32 = arith.constant 0 : i32
    %c0_i32_0 = arith.constant 0 : i32
    %c0_i32_1 = arith.constant 0 : i32
    return %c0_i32, %c0_i32_0 : i32, i32
  }
  func.func @transform_6(%arg0: i32) -> (i32, i32) {
    %c0_i32 = arith.constant 0 : i32
    %c0_i32_0 = arith.constant 0 : i32
    %c0_i32_1 = arith.constant 0 : i32
    return %c0_i32, %c0_i32_0 : i32, i32
  }
  func.func @transform_7(%arg0: i32) -> (i32, i32) {
    %c0_i32 = arith.constant 0 : i32
    %c0_i32_0 = arith.constant 0 : i32
    %c0_i32_1 = arith.constant 0 : i32
    return %c0_i32, %c0_i32_0 : i32, i32
  }
  func.func @transform_8(%arg0: i32) -> (i32, i32) {
    %c0_i32 = arith.constant 0 : i32
    %c0_i32_0 = arith.constant 0 : i32
    %c0_i32_1 = arith.constant 0 : i32
    return %c0_i32, %c0_i32_0 : i32, i32
  }
  func.func @transform_9(%arg0: i32) -> (i32, i32) {
    %c0_i32 = arith.constant 0 : i32
    %c0_i32_0 = arith.constant 0 : i32
    %c0_i32_1 = arith.constant 0 : i32
    return %c0_i32, %c0_i32_0 : i32, i32
  }
  func.func @transform_10(%arg0: i32) -> (i32, i32) {
    %c0_i32 = arith.constant 0 : i32
    %c0_i32_0 = arith.constant 0 : i32
    %c0_i32_1 = arith.constant 0 : i32
    return %c0_i32, %c0_i32_0 : i32, i32
  }
  func.func @transform_11(%arg0: i32) -> (i32, i32) {
    %c0_i32 = arith.constant 0 : i32
    %c0_i32_0 = arith.constant 0 : i32
    %c0_i32_1 = arith.constant 0 : i32
    return %c0_i32, %c0_i32_0 : i32, i32
  }
  func.func @transform_12(%arg0: i32) -> (i32, i32) {
    %c0_i32 = arith.constant 0 : i32
    %c0_i32_0 = arith.constant 0 : i32
    %c0_i32_1 = arith.constant 0 : i32
    return %c0_i32, %c0_i32_0 : i32, i32
  }
  func.func @transform_13(%arg0: i32) -> (i32, i32) {
    %c0_i32 = arith.constant 0 : i32
    %c0_i32_0 = arith.constant 0 : i32
    %c0_i32_1 = arith.constant 0 : i32
    return %c0_i32, %c0_i32_0 : i32, i32
  }
  func.func @transform_14(%arg0: i32) -> (i32, i32) {
    %c0_i32 = arith.constant 0 : i32
    %c0_i32_0 = arith.constant 0 : i32
    %c0_i32_1 = arith.constant 0 : i32
    return %c0_i32, %c0_i32_0 : i32, i32
  }
  func.func @transform_15(%arg0: i32) -> (i32, i32) {
    %c0_i32 = arith.constant 0 : i32
    %c0_i32_0 = arith.constant 0 : i32
    %c0_i32_1 = arith.constant 0 : i32
    return %c0_i32, %c0_i32_0 : i32, i32
  }
  func.func @transform_16(%arg0: i32) -> (i32, i32) {
    %c0_i32 = arith.constant 0 : i32
    %c0_i32_0 = arith.constant 0 : i32
    %c0_i32_1 = arith.constant 0 : i32
    return %c0_i32, %c0_i32_0 : i32, i32
  }
  func.func @transform_17(%arg0: i32) -> (i32, i32) {
    %c0_i32 = arith.constant 0 : i32
    %c0_i32_0 = arith.constant 0 : i32
    %c0_i32_1 = arith.constant 0 : i32
    return %c0_i32, %c0_i32_0 : i32, i32
  }
  func.func @transform_18(%arg0: i32) -> (i32, i32) {
    %c0_i32 = arith.constant 0 : i32
    %c0_i32_0 = arith.constant 0 : i32
    %c0_i32_1 = arith.constant 0 : i32
    return %c0_i32, %c0_i32_0 : i32, i32
  }
  func.func @transform_19(%arg0: i32) -> (i32, i32) {
    %c0_i32 = arith.constant 0 : i32
    %c0_i32_0 = arith.constant 0 : i32
    %c0_i32_1 = arith.constant 0 : i32
    return %c0_i32, %c0_i32_0 : i32, i32
  }
  func.func @transform_20(%arg0: i32) -> (i32, i32) {
    %c0_i32 = arith.constant 0 : i32
    %c0_i32_0 = arith.constant 0 : i32
    %c0_i32_1 = arith.constant 0 : i32
    return %c0_i32, %c0_i32_0 : i32, i32
  }
  func.func @transform_21(%arg0: i32) -> (i32, i32) {
    %c0_i32 = arith.constant 0 : i32
    %c0_i32_0 = arith.constant 0 : i32
    %c0_i32_1 = arith.constant 0 : i32
    return %c0_i32, %c0_i32_0 : i32, i32
  }
  func.func @transform_22(%arg0: i32) -> (i32, i32) {
    %c0_i32 = arith.constant 0 : i32
    %c0_i32_0 = arith.constant 0 : i32
    %c0_i32_1 = arith.constant 0 : i32
    return %c0_i32, %c0_i32_0 : i32, i32
  }
  func.func @transform_23(%arg0: i32) -> (i32, i32) {
    %c0_i32 = arith.constant 0 : i32
    %c0_i32_0 = arith.constant 0 : i32
    %c0_i32_1 = arith.constant 0 : i32
    return %c0_i32, %c0_i32_0 : i32, i32
  }
  func.func @transform_24(%arg0: i32) -> (i32, i32) {
    %c0_i32 = arith.constant 0 : i32
    %c0_i32_0 = arith.constant 0 : i32
    %c0_i32_1 = arith.constant 0 : i32
    return %c0_i32, %c0_i32_0 : i32, i32
  }
  func.func @transform_25(%arg0: i32) -> (i32, i32, i32) {
    %c0_i32 = arith.constant 0 : i32
    %c0_i32_0 = arith.constant 0 : i32
    %c0_i32_1 = arith.constant 0 : i32
    return %arg0, %c0_i32, %c0_i32_0 : i32, i32, i32
  }
}

</mosaic_0001>

<bundles_post_ra>
// kernel: _lambda_.1
= control target key start
LH: loop header
LB: loop body
LE: loop exit
PB: predicated region body
PF: predicated region fallthrough
CT: control target
= control target key end

     0   :  { %s3173_s29 = smov 0   ;;  %s3689_s0 = inlined_call_operand.vmem [shape: f32[8,64,5], index: 0, kind: input, shape index: {}]   ;;  %s3690_s1 = inlined_call_operand.vmem [shape: bf16[8,64,64], index: 1, kind: input, shape index: {}]   ;;  %s3691_s2 = inlined_call_operand.vmem [shape: bf16[64,128], index: 2, kind: input, shape index: {}]   ;;  %s3692_s3 = inlined_call_operand.vmem [shape: f32[2,128], index: 3, kind: input, shape index: {}]   ;;  %s3693_s4 = inlined_call_operand.vmem [shape: f32[2,16], index: 4, kind: input, shape index: {}]   ;;  %s3694_s5 = inlined_call_operand.vmem [shape: f32[5,16], index: 5, kind: input, shape index: {}]   ;;  %s3695_s6 = inlined_call_operand.vmem [shape: f32[1,16], index: 6, kind: input, shape index: {}]   ;;  %s3696_s7 = inlined_call_operand.vmem [shape: f32[16,16], index: 7, kind: input, shape index: {}]   ;;  %s3697_s8 = inlined_call_operand.vmem [shape: f32[16,128], index: 8, kind: input, shape index: {}]   ;;  %s3698_s9 = inlined_call_operand.vmem [shape: f32[1,16], index: 9, kind: input, shape index: {}]   ;;  %s3699_s10 = inlined_call_operand.vmem [shape: f32[1,16], index: 10, kind: input, shape index: {}]   ;;  %s3700_s11 = inlined_call_operand.vmem [shape: f32[1,16], index: 11, kind: input, shape index: {}]   ;;  %s3701_s12 = inlined_call_operand.vmem [shape: f32[1,16], index: 12, kind: input, shape index: {}]   ;;  %s3702_s13 = inlined_call_operand.vmem [shape: f32[16,16], index: 13, kind: input, shape index: {}]   ;;  %s3703_s14 = inlined_call_operand.vmem [shape: f32[16,128], index: 14, kind: input, shape index: {}]   ;;  %s3704_s15 = inlined_call_operand.vmem [shape: f32[1,16], index: 15, kind: input, shape index: {}]   ;;  %s3705_s16 = inlined_call_operand.vmem [shape: f32[1,16], index: 16, kind: input, shape index: {}]   ;;  %s3706_s17 = inlined_call_operand.vmem [shape: f32[1,16], index: 17, kind: input, shape index: {}]   ;;  %s3707_s18 = inlined_call_operand.vmem [shape: f32[1,16], index: 18, kind: input, shape index: {}]   ;;  %s3708_s19 = inlined_call_operand.vmem [shape: f32[16,4], index: 19, kind: input, shape index: {}]   ;;  %s3709_s20 = inlined_call_operand.vmem [shape: f32[1,4], index: 20, kind: input, shape index: {}]   ;;  %s3710_s21 = inlined_call_operand.vmem [shape: f32[1,4], index: 21, kind: input, shape index: {}]   ;;  %s3711_s22 = inlined_call_operand.vmem [shape: f32[1,4], index: 22, kind: input, shape index: {}]   ;;  %s3712_s23 = inlined_call_operand.vmem [shape: f32[4,3], index: 23, kind: input, shape index: {}]   ;;  %s3713_s24 = inlined_call_operand.vmem [shape: f32[1,3], index: 24, kind: input, shape index: {}]   ;;  %s3714_s25 = inlined_call_operand.vmem [shape: f32[8,64,3], index: 25, kind: output, shape index: {}]  }
   0x1   :  { %3718 = sst [smem:[#allocation2_spill]] %s3689_s0 }
   0x2   :  { %3719 = sst [smem:[#allocation3_spill]] %s3690_s1 }
   0x3   :  { %3720 = sst [smem:[#allocation4_spill]] %s3691_s2 }
   0x4   :  { %3721 = sst [smem:[#allocation5_spill]] %s3692_s3 }
   0x5   :  { %3722 = sst [smem:[#allocation6_spill]] %s3693_s4 }
   0x6   :  { %3723 = sst [smem:[#allocation7_spill]] %s3694_s5 }
   0x7   :  { %3724 = sst [smem:[#allocation8_spill]] %s3695_s6 }
   0x8   :  { %3725 = sst [smem:[#allocation9_spill]] %s3696_s7 }
   0x9   :  { %3726 = sst [smem:[#allocation10_spill]] %s3697_s8 }
   0xa   :  { %3727 = sst [smem:[#allocation11_spill]] %s3698_s9 }
   0xb LB: > { %s2722_s2 = sadd.s32 4294967295, %s3039_s29   ;;  %p2726_p0 = scmp.ge.s32.totalorder %s3039_s29, 1  ;;  %s3039_s29 = sphi %s3173_s29, %s35_s29  }
   0xc   : > { %p697_p1 = scmp.lt.s32.totalorder %s3039_s29, 9 }
   0xe   : > { %p698_p2 = pnand %p2726_p0, %p697_p1 }
   0xf   : > { %s3728_s7 = sld [smem:[#allocation7_spill]] (!%p698_p2)  ;;  %p770_p3 = scmp.lt.s32.totalorder (!%p698_p2), %s2722_s2, 7 }
  0x10   : > { %701 = sbr.rel (%p698_p2) target bundleno = 2817 (0xb01), region = 120  ;;  %s3729_s8 = sld [smem:[#allocation2_spill]] (!%p698_p2) }
  0x11   : > { %s3730_s9 = sld [smem:[#allocation9_spill]] (!%p698_p2) }
  0x12   : > { %s3733_s0 = sld [smem:[#allocation4_spill]] (!%p698_p2) }
  0x13   : > { %s3734_s6 = sld [smem:[#allocation3_spill]] (!%p698_p2) }
  0x14   : > { %s3735_s1 = sld [smem:[#allocation6_spill]] (!%p698_p2) }
  0x15   : > { %v938_v0 = vld [vmem:[%s3728_s7] sm:$0x1f]  ;;  %vm968_vm0 = vcmask 1044480   ;;  %s3743_s2 = smov (!%p770_p3, %s2722_s2), 7  ;;  %vm943_vm1 = vcmask 39936   ;;  %s3731_s7 = sld [smem:[#allocation8_spill]] }
  0x16   : > { %2769 = vmatpush.msk.msra.mxu1 %vm968_vm0, %v938_v0  ;;  %s2898_s3 = sshll.u32 %s3743_s2, 6  ;;  %vm1015_vm2 = vcmask 130048   ;;  %s2899_s4 = sshll.u32 %s3743_s2, 5  ;;  %vm872_vm3 = vcmask 523264  }
  0x17   : > { %s774_s27 = scalar_lea.vmem %s3729_s8, %s2898_s3  ;;  %v1014_v9 = vld [vmem:[%s3730_s9 + $0x8] sm:$0xff]  ;;  %v1013_v10 = vld [vmem:[%s3730_s9] sm:$0xff]  ;;  %s3732_s8 = sld [smem:[#allocation10_spill]] }
  0x18   : > { %v930_v1 = vld [vmem:[%s774_s27] sm:$0xff]  ;;  %v931_v2 = vld [vmem:[%s774_s27 + $0x8] sm:$0xff]  ;;  %v932_v3 = vld [vmem:[%s774_s27 + $0x10] sm:$0xff]  ;;  %1054 = vmatpush.msrb.mxu1 %v1014_v9  ;;  %2909 = vmatpush.msra.mxu2 %v1014_v9  ;;  %s3736_s28 = sld [smem:[#allocation11_spill]]  ;;  %s784_s5 = scalar_lea.vmem %s3714_s25, %s2898_s3 }
  0x19   : > { %2770 = vmatmul.msk.f32.vlgmr.msra.gmra.mxu1 %vm943_vm1, %v930_v1  ;;  %v933_v4 = vld [vmem:[%s774_s27 + $0x18] sm:$0xff]  ;;  %v934_v5 = vld [vmem:[%s774_s27 + $0x20] sm:$0xff]  ;;  %v935_v6 = vld [vmem:[%s774_s27 + $0x28] sm:$0xff]  ;;  %s3253_s30 = scalar_lea.vmem %s3734_s6, %s2899_s4 }
  0x1a   : > { %v936_v7 = vld [vmem:[%s774_s27 + $0x30] sm:$0xff]  ;;  %v937_v8 = vld [vmem:[%s774_s27 + $0x38] sm:$0xff]  ;;  %1055 = vmatpush.msrb.mxu1 %v1013_v10  ;;  %2910 = vmatpush.msra.mxu2 %v1013_v10  ;;  %v2906_v35 = vld [vmem:[%s3733_s0 + $0x8] sm:$0xff] }
  0x1b   : > { %v2921_v11 = vld [vmem:[%s3731_s7] ss:$0 sm:$0xff]  ;;  %v2908_v32 = vld [vmem:[%s3733_s0 + $0x18] sm:$0xff]  ;;  %v2907_v34 = vld [vmem:[%s3733_s0 + $0x10] sm:$0xff]  ;;  %s3737_s7 = sld [smem:[#allocation5_spill]] }
  0x1c   : > { %889 = vmatpush.bf16.msra.mxu0 %v2908_v32  ;;  %v2905_v37 = vld [vmem:[%s3733_s0] sm:$0xff]  ;;  %v2902_v47 = vld [vmem:[%s3253_s30 + $0x8] sm:$0xff]  ;;  %v2903_v57 = vld [vmem:[%s3253_s30 + $0x10] sm:$0xff] }
  0x1d   : > { %v1100_v20 = vld [vmem:[%s3732_s8 + $0x8] sm:$0xff]  ;;  %v1099_v29 = vld [vmem:[%s3732_s8] sm:$0xff]  ;;  %v2904_v0 = vld [vmem:[%s3253_s30 + $0x18] sm:$0xff] }
  0x1e   : > { %1212 = vmatpush.msra.mxu1 %v1100_v20  ;;  %v2901_v40 = vld [vmem:[%s3253_s30] sm:$0xff] }
  0x1f   : > { %v3262_v42 = vld [vmem:[%s3735_s1] sm:$0x3] }
  0x20   : > { %1213 = vmatpush.msra.mxu1 %v1099_v29  ;;  %890 = vmatpush.bf16.msra.mxu0 %v2907_v34  ;;  %v3265_v43 = vperm.slane %v3262_v42, 1  ;;  %v3286_v54 = vperm.slane %v3262_v42, 0  ;;  %v1101_v1 = vld [vmem:[%s3736_s28] sm:$0x1] }
  0x21   : > { %2771 = vmatmul.msk.f32.gmra.mxu1 %vm943_vm1, %v931_v2 }
  0x24   : > { %891 = vmatpush.bf16.msra.mxu0 %v2906_v35 }
  0x28   : > { %892 = vmatpush.bf16.msra.mxu0 %v2905_v37 }
  0x29   : > { %2772 = vmatmul.msk.f32.gmra.mxu1 %vm943_vm1, %v932_v3 }
  0x2b   : > { %2765 = vmatmul.msk.bf16.vlgmr.msra.gmra.mxu0 %vm872_vm3, %v2901_v40 }
  0x31   : > { %2773 = vmatmul.msk.f32.gmra.mxu1 %vm943_vm1, %v933_v4 }
  0x39   : > { %2774 = vmatmul.msk.f32.gmra.mxu1 %vm943_vm1, %v934_v5 }
  0x3b   : > { %2766 = vmatmul.msk.bf16.gmra.mxu0 %vm872_vm3, %v2902_v47 }
  0x41   : > { %2775 = vmatmul.msk.f32.gmra.mxu1 %vm943_vm1, %v935_v6 }
  0x49   : > { %2776 = vmatmul.msk.f32.gmra.mxu1 %vm943_vm1, %v936_v7 }
  0x4b   : > { %2767 = vmatmul.msk.bf16.gmra.mxu0 %vm872_vm3, %v2903_v57 }
  0x51   : > { %2777 = vmatmul.msk.f32.gmra.mxu1 %vm943_vm1, %v937_v8 }
  0x5b   : > { %2768 = vmatmul.msk.bf16.gmra.mxu0 %vm872_vm3, %v2904_v0 }
  0x96   : > { %v989_v12 = vpop.f32.mrf.mxu1 }
  0x97   : > { %v990_v13 = vadd.f32 %v2921_v11, %v989_v12 }
  0x99   : > { %2778 = vmatmul.msk.f32.vlgmr.msrb.gmra.mxu1 %vm1015_vm2, %v990_v13 }
  0x9e   : > { %v992_v14 = vpop.f32.mrf.mxu1 }
  0x9f   : > { %v993_v15 = vadd.f32 %v2921_v11, %v992_v14  ;;  %v3322_v14 = vld [vmem:[%s3737_s7] sm:$0x3] }
  0xa0   : > { %1326 = vmatpush.xpose.msrb.mxu2 %v3322_v14 }
  0xa1   : > { %2779 = vmatmul.msk.f32.vlgmr.msra.gmra.mxu2 %vm1015_vm2, %v993_v15 }
  0xa6   : > { %v995_v16 = vpop.f32.mrf.mxu1 }
  0xa7   : > { %v996_v17 = vadd.f32 %v2921_v11, %v995_v16 }
  0xa8   : > { %v894_v3 = vpop.f32.mrf.mxu0 }
  0xa9   : > { %2780 = vmatmul.msk.f32.gmra.mxu2 %vm1015_vm2, %v996_v17  ;;  %vm914_vm6 = vcmp.gt.f32.partialorder %v894_v3, 0.0 }
  0xae   : > { %v998_v18 = vpop.f32.mrf.mxu1 }
  0xaf   : > { %v999_v19 = vadd.f32 %v2921_v11, %v998_v18 }
  0xb0   : > { %v896_v5 = vpop.f32.mrf.mxu0 }
  0xb1   : > { %2781 = vmatmul.msk.f32.gmra.mxu2 %vm1015_vm2, %v999_v19  ;;  %vm915_vm14 = vcmp.gt.f32.partialorder %v896_v5, 0.0 }
  0xb6   : > { %v1001_v21 = vpop.f32.mrf.mxu1 }
  0xb7   : > { %v1002_v22 = vadd.f32 %v2921_v11, %v1001_v21  ;;  %v3041_v21 = vmov -1e+30  }
  0xb8   : > { %v899_v7 = vpop.f32.mrf.mxu0  ;;  %v3332_v29 = vsel %vm914_vm6, 0.0, %v3041_v21  ;;  %vm1434_vm6 = vcmask 1041408  }
  0xb9   : > { %2782 = vmatmul.msk.f32.gmra.mxu2 %vm1015_vm2, %v1002_v22  ;;  %vm916_vm4 = vcmp.gt.f32.partialorder %v899_v7, 0.0 }
  0xbe   : > { %v1004_v23 = vpop.f32.mrf.mxu1 }
  0xbf   : > { %v1005_v24 = vadd.f32 %v2921_v11, %v1004_v23  ;;  %v3329_v23 = vsel %vm916_vm4, 0.0, %v3041_v21 }
  0xc0   : > { %v901_v9 = vpop.f32.mrf.mxu0 }
  0xc1   : > { %2783 = vmatmul.msk.f32.gmra.mxu2 %vm1015_vm2, %v1005_v24  ;;  %vm917_vm11 = vcmp.gt.f32.partialorder %v901_v9, 0.0 }
  0xc6   : > { %v1007_v25 = vpop.f32.mrf.mxu1 }
  0xc7   : > { %v1008_v26 = vadd.f32 %v2921_v11, %v1007_v25 }
  0xc9   : > { %2784 = vmatmul.msk.f32.gmra.mxu2 %vm1015_vm2, %v1008_v26 }
  0xce   : > { %v1010_v27 = vpop.f32.mrf.mxu1 }
  0xcf   : > { %v1011_v28 = vadd.f32 %v2921_v11, %v1010_v27  ;;  %v904_v11 = vpop.f32.mrf.mxu0 }
  0xd0   : > { %vm918_vm5 = vcmp.gt.f32.partialorder %v904_v11, 0.0 }
  0xd1   : > { %2785 = vmatmul.msk.f32.gmra.mxu2 %vm1015_vm2, %v1011_v28  ;;  %v3326_v22 = vsel %vm918_vm5, 0.0, %v3041_v21 }
  0xd7   : > { %v906_v13 = vpop.f32.mrf.mxu0 }
  0xd8   : > { %vm919_vm10 = vcmp.gt.f32.partialorder %v906_v13, 0.0 }
  0xdf   : > { %v909_v26 = vpop.f32.mrf.mxu0 }
  0xe0   : > { %vm920_vm4 = vcmp.gt.f32.partialorder %v909_v26, 0.0 }
 0x116   : > { %v3223_v30 = vpop.f32.mrf.mxu1 }
 0x117   : > { %2803 = vmatmul.msk.f32.vlgmr.msra.gmra.mxu1 %vm1015_vm2, %v3223_v30  ;;  %v1091_v53 = vmul.f32 %v3265_v43, %v3223_v30  ;;  %v1082_v63 = vmul.f32 %v3286_v54, %v3223_v30 }
 0x124   : > { %v3227_v31 = vpop.f32.mrf.mxu2 }
 0x125   : > { %2804 = vmatmul.msk.f32.gmra.mxu1 %vm1015_vm2, %v3227_v31  ;;  %v1092_v52 = vmul.f32 %v3265_v43, %v3227_v31  ;;  %v1083_v62 = vmul.f32 %v3286_v54, %v3227_v31 }
 0x12c   : > { %v3234_v33 = vpop.f32.mrf.mxu2 }
 0x12d   : > { %2805 = vmatmul.msk.f32.gmra.mxu1 %vm1015_vm2, %v3234_v33  ;;  %v1093_v51 = vmul.f32 %v3265_v43, %v3234_v33  ;;  %v1084_v61 = vmul.f32 %v3286_v54, %v3234_v33 }
 0x134   : > { %v1066_v36 = vpop.f32.mrf.mxu2 }
 0x135   : > { %2806 = vmatmul.msk.f32.gmra.mxu1 %vm1015_vm2, %v1066_v36  ;;  %v1094_v50 = vmul.f32 %v3265_v43, %v1066_v36  ;;  %v1085_v60 = vmul.f32 %v3286_v54, %v1066_v36 }
 0x13c   : > { %v1069_v38 = vpop.f32.mrf.mxu2 }
 0x13d   : > { %2807 = vmatmul.msk.f32.gmra.mxu1 %vm1015_vm2, %v1069_v38  ;;  %v1095_v49 = vmul.f32 %v3265_v43, %v1069_v38  ;;  %v1086_v59 = vmul.f32 %v3286_v54, %v1069_v38 }
 0x144   : > { %v1072_v39 = vpop.f32.mrf.mxu2 }
 0x145   : > { %2808 = vmatmul.msk.f32.gmra.mxu1 %vm1015_vm2, %v1072_v39  ;;  %v1096_v48 = vmul.f32 %v3265_v43, %v1072_v39  ;;  %v1087_v58 = vmul.f32 %v3286_v54, %v1072_v39 }
 0x14c   : > { %v1075_v41 = vpop.f32.mrf.mxu2 }
 0x14d   : > { %2809 = vmatmul.msk.f32.gmra.mxu1 %vm1015_vm2, %v1075_v41  ;;  %v1097_v46 = vmul.f32 %v3265_v43, %v1075_v41  ;;  %v1088_v56 = vmul.f32 %v3286_v54, %v1075_v41 }
 0x154   : > { %v1078_v44 = vpop.f32.mrf.mxu2 }
 0x155   : > { %2810 = vmatmul.msk.f32.gmra.mxu1 %vm1015_vm2, %v1078_v44  ;;  %v1098_v45 = vmul.f32 %v3265_v43, %v1078_v44  ;;  %v1089_v55 = vmul.f32 %v3286_v54, %v1078_v44  ;;  %v3341_v44 = vsel %vm919_vm10, 0.0, %v3041_v21 }
 0x157   : > { %2786 = vmatpush.xpose.msk.msra.mxu3 %vm1015_vm2, %v1098_v45  ;;  %1368 = vmatpush.msrb.mxu0 %v1098_v45 }
 0x159   : > { %1369 = vmatpush.msrb.mxu0 %v1097_v46 }
 0x15b   : > { %2787 = vmatpush.xpose.msk.msra.mxu3 %vm1015_vm2, %v1097_v46  ;;  %1370 = vmatpush.msrb.mxu0 %v1096_v48  ;;  %v3344_v46 = vsel %vm917_vm11, 0.0, %v3041_v21 }
 0x15d   : > { %1371 = vmatpush.msrb.mxu0 %v1095_v49 }
 0x15f   : > { %2788 = vmatpush.xpose.msk.msra.mxu3 %vm1015_vm2, %v1096_v48  ;;  %1372 = vmatpush.msrb.mxu0 %v1094_v50 }
 0x161   : > { %1373 = vmatpush.msrb.mxu0 %v1093_v51 }
 0x163   : > { %2789 = vmatpush.xpose.msk.msra.mxu3 %vm1015_vm2, %v1095_v49  ;;  %1374 = vmatpush.msrb.mxu0 %v1092_v52  ;;  %v3347_v49 = vsel %vm915_vm14, 0.0, %v3041_v21 }
 0x165   : > { %1375 = vmatpush.msrb.mxu0 %v1091_v53 }
 0x167   : > { %2790 = vmatpush.xpose.msk.msra.mxu3 %vm1015_vm2, %v1094_v50  ;;  %1376 = vmatpush.msrb.mxu0 %v1089_v55 }
 0x169   : > { %1377 = vmatpush.msrb.mxu0 %v1088_v56 }
 0x16b   : > { %2791 = vmatpush.xpose.msk.msra.mxu3 %vm1015_vm2, %v1093_v51  ;;  %1378 = vmatpush.msrb.mxu0 %v1087_v58 }
 0x16d   : > { %1379 = vmatpush.msrb.mxu0 %v1086_v59 }
 0x16f   : > { %2792 = vmatpush.xpose.msk.msra.mxu3 %vm1015_vm2, %v1092_v52  ;;  %1380 = vmatpush.msrb.mxu0 %v1085_v60  ;;  %v911_v52 = vpop.f32.mrf.mxu0 }
 0x170   : > { %vm921_vm0 = vcmp.gt.f32.partialorder %v911_v52, 0.0 }
 0x171   : > { %1381 = vmatpush.msrb.mxu0 %v1084_v61 }
 0x173   : > { %2793 = vmatpush.xpose.msk.msra.mxu3 %vm1015_vm2, %v1091_v53  ;;  %1382 = vmatpush.msrb.mxu0 %v1083_v62 }
 0x175   : > { %1383 = vmatpush.msrb.mxu0 %v1082_v63 }
 0x177   : > { %2794 = vmatpush.xpose.msk.msra.mxu3 %vm1015_vm2, %v1089_v55 }
 0x17b   : > { %2795 = vmatpush.xpose.msk.msra.mxu3 %vm1015_vm2, %v1088_v56 }
 0x17f   : > { %2796 = vmatpush.xpose.msk.msra.mxu3 %vm1015_vm2, %v1087_v58 }
 0x183   : > { %2797 = vmatpush.xpose.msk.msra.mxu3 %vm1015_vm2, %v1086_v59  ;;  %v3353_v59 = vsel %vm921_vm0, 0.0, %v3041_v21 }
 0x187   : > { %2798 = vmatpush.xpose.msk.msra.mxu3 %vm1015_vm2, %v1085_v60 }
 0x18b   : > { %2799 = vmatpush.xpose.msk.msra.mxu3 %vm1015_vm2, %v1084_v61  ;;  %v3356_v61 = vsel %vm920_vm4, 0.0, %v3041_v21 }
 0x18f   : > { %2800 = vmatpush.xpose.msk.msra.mxu3 %vm1015_vm2, %v1083_v62 }
 0x193   : > { %2801 = vmatpush.xpose.msk.msra.mxu3 %vm1015_vm2, %v1082_v63 }
 0x194   : > { %v1215_v2 = vpop.f32.mrf.mxu1 }
 0x196   : > { %2802 = vmatmul.msk.f32.vlgmr.msra.gmra.mxu3 %vm1015_vm2, %v1101_v1 }
 0x197   : > { %2811 = vmatpush.msk.msrb.mxu3 %vm1434_vm6, %v3262_v42 }
 0x1a2   : > { %v1218_v4 = vpop.f32.mrf.mxu1 }
 0x1aa   : > { %v1221_v6 = vpop.f32.mrf.mxu1 }
 0x1b2   : > { %v1224_v8 = vpop.f32.mrf.mxu1 }
 0x1ba   : > { %v1227_v10 = vpop.f32.mrf.mxu1 }
 0x1c2   : > { %v1230_v12 = vpop.f32.mrf.mxu1 }
 0x1ca   : > { %v1233_v17 = vpop.f32.mrf.mxu1 }
 0x1d2   : > { %v1236_v41 = vpop.f32.mrf.mxu1 }
 0x219   : > { %v1170_v15 = vpop.f32.mrf.mxu3 }
 0x21a   : > { %v1173_v16 = vperm.slane %v1170_v15, 0 }
 0x21c   : > { %v1228_v18 = vadd.f32 %v1227_v10, %v1173_v16  ;;  %v1222_v19 = vadd.f32 %v1221_v6, %v1173_v16  ;;  %v1216_v20 = vadd.f32 %v1215_v2, %v1173_v16  ;;  %v1231_v24 = vadd.f32 %v1230_v12, %v1173_v16 }
 0x21d   : > { %v1225_v25 = vadd.f32 %v1224_v8, %v1173_v16  ;;  %v1219_v31 = vadd.f32 %v1218_v4, %v1173_v16  ;;  %v1237_v48 = vadd.f32 %v1236_v41, %v1173_v16  ;;  %v1234_v51 = vadd.f32 %v1233_v17, %v1173_v16 }
 0x21e   : > { %vm1243_vm7 = vcmp.gt.f32.partialorder %v1228_v18, 0.0  ;;  %v1251_v27 = vmul.f32 0.2, %v1228_v18  ;;  %vm1241_vm8 = vcmp.gt.f32.partialorder %v1222_v19, 0.0  ;;  %v1249_v28 = vmul.f32 0.2, %v1222_v19 }
 0x21f   : > { %vm1239_vm9 = vcmp.gt.f32.partialorder %v1216_v20, 0.0  ;;  %v1247_v30 = vmul.f32 0.2, %v1216_v20  ;;  %v1252_v38 = vmul.f32 0.2, %v1231_v24  ;;  %vm1244_vm12 = vcmp.gt.f32.partialorder %v1231_v24, 0.0 }
 0x220   : > { %v1259_v32 = vsel %vm1243_vm7, %v1228_v18, %v1251_v27  ;;  %v1257_v33 = vsel %vm1241_vm8, %v1222_v19, %v1249_v28  ;;  %v1250_v39 = vmul.f32 0.2, %v1225_v25  ;;  %vm1242_vm13 = vcmp.gt.f32.partialorder %v1225_v25, 0.0 }
 0x221   : > { %v3335_v34 = vadd.f32 %v1259_v32, %v3326_v22  ;;  %v1265_v35 = vadd.f32 %v1257_v33, %v3329_v23  ;;  %v1255_v36 = vsel %vm1239_vm9, %v1216_v20, %v1247_v30  ;;  %v1248_v40 = vmul.f32 0.2, %v1219_v31 }
 0x222   : > { %v1263_v37 = vadd.f32 %v1255_v36, %v3332_v29  ;;  %vm1240_vm15 = vcmp.gt.f32.partialorder %v1219_v31, 0.0  ;;  %v1260_v45 = vsel %vm1244_vm12, %v1231_v24, %v1252_v38  ;;  %v1258_v47 = vsel %vm1242_vm13, %v1225_v25, %v1250_v39 }
 0x223   : > { %1279 = vmax.xlane.f32.xlu2 %v3335_v34  ;;  %1275 = vmax.xlane.f32.xlu1 %v1265_v35  ;;  %v1256_v50 = vsel %vm1240_vm15, %v1219_v31, %v1248_v40  ;;  %v1268_v53 = vadd.f32 %v1260_v45, %v3341_v44  ;;  %v1266_v55 = vadd.f32 %v1258_v47, %v3344_v46  ;;  %v1254_v57 = vmul.f32 0.2, %v1237_v48 }
 0x224   : > { %1271 = vmax.xlane.f32.xlu0 %v1263_v37  ;;  %v1264_v56 = vadd.f32 %v1256_v50, %v3347_v49  ;;  %vm1246_vm1 = vcmp.gt.f32.partialorder %v1237_v48, 0.0  ;;  %v1253_v58 = vmul.f32 0.2, %v1234_v51  ;;  %vm1245_vm5 = vcmp.gt.f32.partialorder %v1234_v51, 0.0 }
 0x225   : > { %v1262_v60 = vsel %vm1246_vm1, %v1237_v48, %v1254_v57  ;;  %vm1409_vm7 = vcmask 15360  }
 0x226   : > { %v1261_v62 = vsel %vm1245_vm5, %v1234_v51, %v1253_v58  ;;  %v1270_v63 = vadd.f32 %v1262_v60, %v3353_v59 }
 0x227   : > { %v1269_v0 = vadd.f32 %v1261_v62, %v3356_v61 }
 0x22b   : > { %1281 = vmax.xlane.f32.xlu2 %v1268_v53  ;;  %1277 = vmax.xlane.f32.xlu1 %v1266_v55 }
 0x22c   : > { %1273 = vmax.xlane.f32.xlu0 %v1264_v56 }
 0x233   : > { %1285 = vmax.xlane.f32.xlu1 %v1270_v63 }
 0x234   : > { %1283 = vmax.xlane.f32.xlu0 %v1269_v0 }
 0x296   : > { %v1276_v5 = vpop.xlane.xlu1 %1275  ;;  %v1280_v15 = vpop.xlane.xlu2 %1279 }
 0x297   : > { %v1272_v1 = vpop.xlane.xlu0 %1271  ;;  %v1289_v9 = vsub.f32 %v1265_v35, %v1276_v5  ;;  %v1291_v18 = vsub.f32 %v3335_v34, %v1280_v15 }
 0x298   : > { %v1287_v2 = vsub.f32 %v1263_v37, %v1272_v1 }
 0x299   : > { %v1299_v10 = vmul.f32 1.442695, %v1289_v9  ;;  %v1303_v19 = vmul.f32 1.442695, %v1291_v18 }
 0x29a   : > { %v1295_v3 = vmul.f32 1.442695, %v1287_v2 }
 0x29c   : > { %2931 = vpow2.f32 %v1295_v3 }
 0x29e   : > { %v1278_v11 = vpop.xlane.xlu1 %1277  ;;  %v1282_v20 = vpop.xlane.xlu2 %1281 }
 0x29f   : > { %v1274_v4 = vpop.xlane.xlu0 %1273  ;;  %v1290_v13 = vsub.f32 %v1266_v55, %v1278_v11  ;;  %v1292_v25 = vsub.f32 %v1268_v53, %v1282_v20 }
 0x2a0   : > { %v1288_v6 = vsub.f32 %v1264_v56, %v1274_v4 }
 0x2a1   : > { %v1301_v16 = vmul.f32 1.442695, %v1290_v13  ;;  %v1305_v26 = vmul.f32 1.442695, %v1292_v25 }
 0x2a2   : > { %v1297_v7 = vmul.f32 1.442695, %v1288_v6  ;;  %v2932_v8 = vpop.eup %2931 }
 0x2a3   : > { %1327 = vmatmul.f32.vlgmr.msrb.gmra.mxu2 %v2932_v8  ;;  %1384 = vmatmul.f32.vlgmr.msrb.gmra.mxu0 %v2932_v8 }
 0x2a4   : > { %2933 = vpow2.f32 %v1297_v7 }
 0x2a5   : > { %2935 = vpow2.f32 %v1299_v10 }
 0x2a6   : > { %2937 = vpow2.f32 %v1301_v16  ;;  %v1286_v32 = vpop.xlane.xlu1 %1285 }
 0x2a7   : > { %2939 = vpow2.f32 %v1303_v19  ;;  %v1284_v27 = vpop.xlane.xlu0 %1283  ;;  %v1294_v34 = vsub.f32 %v1270_v63, %v1286_v32 }
 0x2a8   : > { %2941 = vpow2.f32 %v1305_v26  ;;  %v1293_v30 = vsub.f32 %v1269_v0, %v1284_v27 }
 0x2a9   : > { %v1309_v35 = vmul.f32 1.442695, %v1294_v34 }
 0x2aa   : > { %v2934_v12 = vpop.eup %2933  ;;  %v1307_v31 = vmul.f32 1.442695, %v1293_v30 }
 0x2ab   : > { %1330 = vmatmul.f32.gmra.mxu2 %v2934_v12  ;;  %1387 = vmatmul.f32.gmra.mxu0 %v2934_v12  ;;  %v2936_v17 = vpop.eup %2935 }
 0x2ac   : > { %v2938_v24 = vpop.eup %2937  ;;  %2943 = vpow2.f32 %v1307_v31 }
 0x2ad   : > { %v2940_v28 = vpop.eup %2939  ;;  %2945 = vpow2.f32 %v1309_v35 }
 0x2ae   : > { %v2942_v33 = vpop.eup %2941 }
 0x2b2   : > { %v2944_v36 = vpop.eup %2943 }
 0x2b3   : > { %1333 = vmatmul.f32.gmra.mxu2 %v2936_v17  ;;  %1390 = vmatmul.f32.gmra.mxu0 %v2936_v17  ;;  %v2946_v37 = vpop.eup %2945 }
 0x2bb   : > { %1336 = vmatmul.f32.gmra.mxu2 %v2938_v24  ;;  %1393 = vmatmul.f32.gmra.mxu0 %v2938_v24  ;;  %v2922_v24 = vld [vmem:[%s3699_s10] ss:$0 sm:$0xff] }
 0x2c3   : > { %1339 = vmatmul.f32.gmra.mxu2 %v2940_v28  ;;  %1396 = vmatmul.f32.gmra.mxu0 %v2940_v28 }
 0x2cb   : > { %1342 = vmatmul.f32.gmra.mxu2 %v2942_v33  ;;  %1399 = vmatmul.f32.gmra.mxu0 %v2942_v33 }
 0x2d3   : > { %1345 = vmatmul.f32.gmra.mxu2 %v2944_v36  ;;  %1402 = vmatmul.f32.gmra.mxu0 %v2944_v36 }
 0x2db   : > { %1348 = vmatmul.f32.gmra.mxu2 %v2946_v37  ;;  %1405 = vmatmul.f32.gmra.mxu0 %v2946_v37  ;;  %v3042_v37 = vmov 64.0  }
 0x320   : > { %v1385_v6 = vpop.f32.mrf.mxu0 }
 0x326   : > { %v1328_v38 = vpop.f32.mrf.mxu2 }
 0x327   : > { %v1352_v39 = vmax.f32 %v1328_v38, 1e-20 }
 0x328   : > { %v1388_v7 = vpop.f32.mrf.mxu0 }
 0x329   : > { %2947 = vrcp.f32 %v1352_v39 }
 0x32e   : > { %v1331_v40 = vpop.f32.mrf.mxu2 }
 0x32f   : > { %v2948_v41 = vpop.eup %2947  ;;  %v1353_v45 = vmax.f32 %v1331_v40, 1e-20 }
 0x330   : > { %2812 = vmatmul.msk.f32.vlgmr.msrb.gmra.mxu3 %vm1409_vm7, %v2948_v41  ;;  %v1391_v9 = vpop.f32.mrf.mxu0 }
 0x331   : > { %2949 = vrcp.f32 %v1353_v45 }
 0x336   : > { %v1334_v47 = vpop.f32.mrf.mxu2 }
 0x337   : > { %v2950_v48 = vpop.eup %2949  ;;  %v1354_v50 = vmax.f32 %v1334_v47, 1e-20 }
 0x338   : > { %2813 = vmatmul.msk.f32.gmra.mxu3 %vm1409_vm7, %v2950_v48  ;;  %v1394_v11 = vpop.f32.mrf.mxu0 }
 0x339   : > { %2951 = vrcp.f32 %v1354_v50 }
 0x33e   : > { %v1337_v51 = vpop.f32.mrf.mxu2 }
 0x33f   : > { %v2952_v52 = vpop.eup %2951  ;;  %v1355_v53 = vmax.f32 %v1337_v51, 1e-20 }
 0x340   : > { %2814 = vmatmul.msk.f32.gmra.mxu3 %vm1409_vm7, %v2952_v52  ;;  %v1397_v15 = vpop.f32.mrf.mxu0 }
 0x341   : > { %2953 = vrcp.f32 %v1355_v53 }
 0x346   : > { %v1340_v55 = vpop.f32.mrf.mxu2 }
 0x347   : > { %v2954_v56 = vpop.eup %2953  ;;  %v1356_v57 = vmax.f32 %v1340_v55, 1e-20 }
 0x348   : > { %2815 = vmatmul.msk.f32.gmra.mxu3 %vm1409_vm7, %v2954_v56  ;;  %v1400_v17 = vpop.f32.mrf.mxu0 }
 0x349   : > { %2955 = vrcp.f32 %v1356_v57 }
 0x34e   : > { %v1343_v58 = vpop.f32.mrf.mxu2 }
 0x34f   : > { %v2956_v60 = vpop.eup %2955  ;;  %v1357_v62 = vmax.f32 %v1343_v58, 1e-20 }
 0x350   : > { %2816 = vmatmul.msk.f32.gmra.mxu3 %vm1409_vm7, %v2956_v60  ;;  %v1403_v32 = vpop.f32.mrf.mxu0 }
 0x351   : > { %2957 = vrcp.f32 %v1357_v62 }
 0x356   : > { %v1346_v63 = vpop.f32.mrf.mxu2 }
 0x357   : > { %v2958_v0 = vpop.eup %2957  ;;  %v1358_v1 = vmax.f32 %v1346_v63, 1e-20 }
 0x358   : > { %2817 = vmatmul.msk.f32.gmra.mxu3 %vm1409_vm7, %v2958_v0  ;;  %v1406_v57 = vpop.f32.mrf.mxu0 }
 0x359   : > { %2959 = vrcp.f32 %v1358_v1 }
 0x35e   : > { %v1349_v2 = vpop.f32.mrf.mxu2 }
 0x35f   : > { %v2960_v3 = vpop.eup %2959  ;;  %v1359_v4 = vmax.f32 %v1349_v2, 1e-20 }
 0x360   : > { %2818 = vmatmul.msk.f32.gmra.mxu3 %vm1409_vm7, %v2960_v3 }
 0x361   : > { %2961 = vrcp.f32 %v1359_v4 }
 0x362   : > { %2963 = vrcp.f32 %v3042_v37 }
 0x367   : > { %v2962_v5 = vpop.eup %2961 }
 0x368   : > { %2819 = vmatmul.msk.f32.gmra.mxu3 %vm1409_vm7, %v2962_v5  ;;  %v2964_v53 = vpop.eup %2963 }
 0x369   : > { %v1521_v0 = vmul.f32 64.0, %v2964_v53  ;;  %vm1525_vm8 = vweird.f32 %v2964_v53 }
 0x36b   : > { %v1522_v5 = vsub.f32 1.0, %v1521_v0  ;;  %v1618_v0 = vld [vmem:[%s3702_s13 + $0x8] sm:$0xff] }
 0x36c   : > { %1657 = vmatpush.msrb.mxu1 %v1618_v0  ;;  %v1700_v0 = vld [vmem:[%s3703_s14] sm:$0xff] }
 0x3b3   : > { %v1455_v8 = vpop.f32.mrf.mxu3 }
 0x3b4   : > { %v1479_v20 = vmul.f32 %v1455_v8, %v1385_v6  ;;  %v1523_v8 = vmul.f32 %v2964_v53, %v1522_v5 }
 0x3b6   : > { %v1491_v28 = vadd.f32 %v2922_v24, %v1479_v20 }
 0x3b8   : > { %v1499_v38 = vsel %vm1015_vm2, %v1491_v28, 0.0 }
 0x3bb   : > { %v1458_v10 = vpop.f32.mrf.mxu3 }
 0x3bc   : > { %v1480_v18 = vmul.f32 %v1458_v10, %v1388_v7 }
 0x3be   : > { %v1492_v26 = vadd.f32 %v2922_v24, %v1480_v18 }
 0x3c0   : > { %v1500_v33 = vsel %vm1015_vm2, %v1492_v26, 0.0 }
 0x3c1   : > { %v1501_v45 = vadd.f32 %v1500_v33, %v1499_v38 }
 0x3c3   : > { %v1461_v12 = vpop.f32.mrf.mxu3 }
 0x3c4   : > { %v1481_v25 = vmul.f32 %v1461_v12, %v1391_v9 }
 0x3c6   : > { %v1493_v30 = vadd.f32 %v2922_v24, %v1481_v25 }
 0x3c8   : > { %v1502_v39 = vsel %vm1015_vm2, %v1493_v30, 0.0 }
 0x3c9   : > { %v1503_v50 = vadd.f32 %v1502_v39, %v1501_v45 }
 0x3cb   : > { %v1464_v13 = vpop.f32.mrf.mxu3 }
 0x3cc   : > { %v1482_v27 = vmul.f32 %v1464_v13, %v1394_v11  ;;  %v1524_v11 = vadd.f32 %v2964_v53, %v1523_v8 }
 0x3ce   : > { %v1494_v34 = vadd.f32 %v2922_v24, %v1482_v27 }
 0x3d0   : > { %v1504_v47 = vsel %vm1015_vm2, %v1494_v34, 0.0 }
 0x3d1   : > { %v1505_v55 = vadd.f32 %v1504_v47, %v1503_v50 }
 0x3d3   : > { %v1467_v16 = vpop.f32.mrf.mxu3 }
 0x3d4   : > { %v1483_v31 = vmul.f32 %v1467_v16, %v1397_v15  ;;  %v3382_v15 = vsel %vm1525_vm8, %v2964_v53, %v1524_v11 }
 0x3d6   : > { %v1495_v40 = vadd.f32 %v2922_v24, %v1483_v31 }
 0x3d8   : > { %v1506_v51 = vsel %vm1015_vm2, %v1495_v40, 0.0 }
 0x3d9   : > { %v1507_v58 = vadd.f32 %v1506_v51, %v1505_v55 }
 0x3db   : > { %v1470_v19 = vpop.f32.mrf.mxu3 }
 0x3dc   : > { %v1484_v35 = vmul.f32 %v1470_v19, %v1400_v17 }
 0x3de   : > { %v1496_v48 = vadd.f32 %v2922_v24, %v1484_v35 }
 0x3e0   : > { %v1508_v56 = vsel %vm1015_vm2, %v1496_v48, 0.0 }
 0x3e1   : > { %v1509_v1 = vadd.f32 %v1508_v56, %v1507_v58 }
 0x3e3   : > { %v1473_v36 = vpop.f32.mrf.mxu3 }
 0x3e4   : > { %v1485_v41 = vmul.f32 %v1473_v36, %v1403_v32 }
 0x3e6   : > { %v1497_v52 = vadd.f32 %v2922_v24, %v1485_v41 }
 0x3e8   : > { %v1510_v62 = vsel %vm1015_vm2, %v1497_v52, 0.0 }
 0x3e9   : > { %v1511_v3 = vadd.f32 %v1510_v62, %v1509_v1  ;;  %v1617_v1 = vld [vmem:[%s3702_s13] sm:$0xff] }
 0x3ea   : > { %1658 = vmatpush.msrb.mxu1 %v1617_v1 }
 0x3eb   : > { %v1476_v60 = vpop.f32.mrf.mxu3 }
 0x3ec   : > { %v1486_v63 = vmul.f32 %v1476_v60, %v1406_v57  ;;  %2853 = vmatpush.msk.msra.mxu1 %vm1434_vm6, %v3262_v42 }
 0x3ee   : > { %v1498_v2 = vadd.f32 %v2922_v24, %v1486_v63 }
 0x3f0   : > { %v1512_v4 = vsel %vm1015_vm2, %v1498_v2, 0.0 }
 0x3f1   : > { %v1513_v6 = vadd.f32 %v1512_v4, %v1511_v3 }
 0x3f3   : > { %v1514_v7 = vrot.slane %v1513_v6, 4 }
 0x3f5   : > { %v1515_v9 = vadd.f32 %v1514_v7, %v1513_v6 }
 0x3f7   : > { %v1516_v10 = vrot.slane %v1515_v9, 2 }
 0x3f9   : > { %v1517_v12 = vadd.f32 %v1516_v10, %v1515_v9 }
 0x3fb   : > { %v1518_v13 = vrot.slane %v1517_v12, 1 }
 0x3fd   : > { %v1519_v16 = vadd.f32 %v1518_v13, %v1517_v12  ;;  %v2923_v13 = vld [vmem:[%s3700_s11] ss:$0 sm:$0xff] }
 0x3ff   : > { %v1527_v17 = vmul.f32 %v3382_v15, %v1519_v16 }
 0x401   : > { %v1528_v18 = vsub.f32 %v1491_v28, %v1527_v17  ;;  %v1529_v19 = vsub.f32 %v1492_v26, %v1527_v17  ;;  %v3385_v20 = vsub.f32 %v1493_v30, %v1527_v17  ;;  %v3387_v24 = vsub.f32 %v1494_v34, %v1527_v17 }
 0x402   : > { %v3389_v25 = vsub.f32 %v1495_v40, %v1527_v17  ;;  %v3393_v33 = vsub.f32 %v1496_v48, %v1527_v17  ;;  %v3399_v30 = vsub.f32 %v1497_v52, %v1527_v17  ;;  %v3404_v39 = vsub.f32 %v1498_v2, %v1527_v17  ;;  %v2924_v17 = vld [vmem:[%s3701_s12] ss:$0 sm:$0xff] }
 0x403   : > { %v1536_v27 = vmul.f32 %v1528_v18, %v1528_v18  ;;  %v1537_v31 = vmul.f32 %v1529_v19, %v1529_v19  ;;  %v1538_v32 = vmul.f32 %v3385_v20, %v3385_v20  ;;  %v1539_v35 = vmul.f32 %v3387_v24, %v3387_v24 }
 0x404   : > { %v1540_v34 = vmul.f32 %v3389_v25, %v3389_v25  ;;  %v1541_v40 = vmul.f32 %v3393_v33, %v3393_v33  ;;  %v1542_v47 = vmul.f32 %v3399_v30, %v3399_v30  ;;  %v1543_v51 = vmul.f32 %v3404_v39, %v3404_v39 }
 0x405   : > { %v1544_v36 = vsel %vm1015_vm2, %v1536_v27, 0.0  ;;  %v1545_v26 = vsel %vm1015_vm2, %v1537_v31, 0.0  ;;  %v1547_v37 = vsel %vm1015_vm2, %v1538_v32, 0.0  ;;  %v1549_v41 = vsel %vm1015_vm2, %v1539_v35, 0.0 }
 0x406   : > { %v1546_v28 = vadd.f32 %v1545_v26, %v1544_v36  ;;  %v1551_v48 = vsel %vm1015_vm2, %v1540_v34, 0.0  ;;  %v1553_v52 = vsel %vm1015_vm2, %v1541_v40, 0.0  ;;  %v1555_v55 = vsel %vm1015_vm2, %v1542_v47, 0.0 }
 0x407   : > { %v1557_v57 = vsel %vm1015_vm2, %v1543_v51, 0.0 }
 0x408   : > { %v1548_v38 = vadd.f32 %v1547_v37, %v1546_v28 }
 0x40a   : > { %v1550_v45 = vadd.f32 %v1549_v41, %v1548_v38 }
 0x40c   : > { %v1552_v50 = vadd.f32 %v1551_v48, %v1550_v45 }
 0x40e   : > { %v1554_v53 = vadd.f32 %v1553_v52, %v1552_v50 }
 0x410   : > { %v1556_v56 = vadd.f32 %v1555_v55, %v1554_v53 }
 0x412   : > { %v1558_v58 = vadd.f32 %v1557_v57, %v1556_v56 }
 0x414   : > { %v1559_v60 = vrot.slane %v1558_v58, 4 }
 0x416   : > { %v1560_v62 = vadd.f32 %v1559_v60, %v1558_v58 }
 0x418   : > { %v1561_v63 = vrot.slane %v1560_v62, 2 }
 0x41a   : > { %v1562_v2 = vadd.f32 %v1561_v63, %v1560_v62 }
 0x41c   : > { %v1563_v3 = vrot.slane %v1562_v2, 1 }
 0x41e   : > { %v1564_v4 = vadd.f32 %v1563_v3, %v1562_v2 }
 0x420   : > { %v1565_v5 = vmul.f32 %v1564_v4, %v3382_v15 }
 0x422   : > { %v1566_v6 = vadd.f32 1e-05, %v1565_v5 }
 0x424   : > { %2965 = vrsqrt.f32 %v1566_v6  ;;  %vm1573_vm10 = vweird.f32 %v1566_v6 }
 0x42a   : > { %v2966_v7 = vpop.eup %2965 }
 0x42b   : > { %v1568_v8 = vmul.f32 %v2966_v7, %v1566_v6  ;;  %vm1574_vm9 = vweird.f32 %v2966_v7 }
 0x42c   : > { %vm1575_vm11 = vmor %vm1573_vm10, %vm1574_vm9  ;;  %vm2285_vm9 = vcmask 31744  }
 0x42d   : > { %v1569_v9 = vmul.f32 %v2966_v7, %v1568_v8 }
 0x42f   : > { %v1570_v10 = vmul.f32 0.5, %v1569_v9 }
 0x431   : > { %v1571_v11 = vsub.f32 1.5, %v1570_v10 }
 0x433   : > { %v1572_v12 = vmul.f32 %v2966_v7, %v1571_v11 }
 0x435   : > { %v1576_v16 = vsel %vm1575_vm11, %v2966_v7, %v1572_v12 }
 0x436   : > { %v1577_v42 = vmul.f32 %v1576_v16, %v1528_v18  ;;  %v1578_v31 = vmul.f32 %v1576_v16, %v1529_v19  ;;  %v1579_v28 = vmul.f32 %v1576_v16, %v3385_v20  ;;  %v1580_v18 = vmul.f32 %v1576_v16, %v3387_v24  ;;  %v1701_v20 = vld [vmem:[%s3703_s14 + $0x8] sm:$0xff] }
 0x437   : > { %v1581_v45 = vmul.f32 %v1576_v16, %v3389_v25  ;;  %1813 = vmatpush.msra.mxu3 %v1701_v20  ;;  %v1582_v51 = vmul.f32 %v1576_v16, %v3393_v33  ;;  %v1583_v55 = vmul.f32 %v1576_v16, %v3399_v30  ;;  %v1584_v57 = vmul.f32 %v1576_v16, %v3404_v39 }
 0x438   : > { %v1589_v27 = vmul.f32 %v2923_v13, %v1577_v42  ;;  %v1590_v36 = vmul.f32 %v2923_v13, %v1578_v31  ;;  %v1591_v37 = vmul.f32 %v2923_v13, %v1579_v28  ;;  %v1592_v41 = vmul.f32 %v2923_v13, %v1580_v18 }
 0x439   : > { %v1593_v48 = vmul.f32 %v2923_v13, %v1581_v45  ;;  %v1594_v52 = vmul.f32 %v2923_v13, %v1582_v51  ;;  %v1595_v56 = vmul.f32 %v2923_v13, %v1583_v55  ;;  %v1596_v60 = vmul.f32 %v2923_v13, %v1584_v57  ;;  %1814 = vmatpush.msra.mxu3 %v1700_v0 }
 0x43a   : > { %v1601_v32 = vadd.f32 %v2924_v17, %v1589_v27  ;;  %v1602_v26 = vadd.f32 %v2924_v17, %v1590_v36  ;;  %v1603_v38 = vadd.f32 %v2924_v17, %v1591_v37  ;;  %v1604_v19 = vadd.f32 %v2924_v17, %v1592_v41 }
 0x43b   : > { %v1605_v50 = vadd.f32 %v2924_v17, %v1593_v48  ;;  %v1606_v53 = vadd.f32 %v2924_v17, %v1594_v52  ;;  %v1607_v58 = vadd.f32 %v2924_v17, %v1595_v56  ;;  %v1608_v63 = vadd.f32 %v2924_v17, %v1596_v60 }
 0x43c   : > { %v1609_v35 = vmax.f32 %v1601_v32, 0.0  ;;  %v1610_v34 = vmax.f32 %v1602_v26, 0.0  ;;  %v1611_v40 = vmax.f32 %v1603_v38, 0.0  ;;  %v1612_v47 = vmax.f32 %v1604_v19, 0.0 }
 0x43d   : > { %v1613_v24 = vmax.f32 %v1605_v50, 0.0  ;;  %v1614_v25 = vmax.f32 %v1606_v53, 0.0  ;;  %v1615_v62 = vmax.f32 %v1607_v58, 0.0  ;;  %v1616_v33 = vmax.f32 %v1608_v63, 0.0 }
 0x43e   : > { %2820 = vmatmul.msk.f32.vlgmr.msrb.gmra.mxu1 %vm1015_vm2, %v1609_v35 }
 0x446   : > { %2821 = vmatmul.msk.f32.gmra.mxu1 %vm1015_vm2, %v1610_v34 }
 0x44e   : > { %2822 = vmatmul.msk.f32.gmra.mxu1 %vm1015_vm2, %v1611_v40 }
 0x456   : > { %2823 = vmatmul.msk.f32.gmra.mxu1 %vm1015_vm2, %v1612_v47 }
 0x45e   : > { %2824 = vmatmul.msk.f32.gmra.mxu1 %vm1015_vm2, %v1613_v24 }
 0x466   : > { %2825 = vmatmul.msk.f32.gmra.mxu1 %vm1015_vm2, %v1614_v25 }
 0x46e   : > { %2826 = vmatmul.msk.f32.gmra.mxu1 %vm1015_vm2, %v1615_v62 }
 0x476   : > { %2827 = vmatmul.msk.f32.gmra.mxu1 %vm1015_vm2, %v1616_v33 }
 0x4bb   : > { %v1660_v30 = vpop.f32.mrf.mxu1 }
 0x4bc   : > { %2845 = vmatmul.msk.f32.vlgmr.msra.gmra.mxu3 %vm1015_vm2, %v1660_v30  ;;  %v1692_v16 = vmul.f32 %v1660_v30, %v3265_v43  ;;  %v1684_v36 = vmul.f32 %v1660_v30, %v3286_v54 }
 0x4c3   : > { %v1663_v1 = vpop.f32.mrf.mxu1 }
 0x4c4   : > { %2846 = vmatmul.msk.f32.gmra.mxu3 %vm1015_vm2, %v1663_v1  ;;  %v1693_v13 = vmul.f32 %v1663_v1, %v3265_v43  ;;  %v1685_v35 = vmul.f32 %v1663_v1, %v3286_v54 }
 0x4cb   : > { %v1666_v39 = vpop.f32.mrf.mxu1 }
 0x4cc   : > { %2847 = vmatmul.msk.f32.gmra.mxu3 %vm1015_vm2, %v1666_v39  ;;  %v1694_v12 = vmul.f32 %v1666_v39, %v3265_v43  ;;  %v1686_v32 = vmul.f32 %v1666_v39, %v3286_v54 }
 0x4d3   : > { %v1669_v2 = vpop.f32.mrf.mxu1 }
 0x4d4   : > { %2848 = vmatmul.msk.f32.gmra.mxu3 %vm1015_vm2, %v1669_v2  ;;  %v1695_v11 = vmul.f32 %v1669_v2, %v3265_v43 }
 0x4db   : > { %v1672_v3 = vpop.f32.mrf.mxu1 }
 0x4dc   : > { %2849 = vmatmul.msk.f32.gmra.mxu3 %vm1015_vm2, %v1672_v3  ;;  %v1696_v10 = vmul.f32 %v1672_v3, %v3265_v43  ;;  %v1688_v31 = vmul.f32 %v1672_v3, %v3286_v54 }
 0x4e3   : > { %v1675_v4 = vpop.f32.mrf.mxu1 }
 0x4e4   : > { %2850 = vmatmul.msk.f32.gmra.mxu3 %vm1015_vm2, %v1675_v4  ;;  %v1697_v9 = vmul.f32 %v1675_v4, %v3265_v43  ;;  %v1689_v27 = vmul.f32 %v1675_v4, %v3286_v54 }
 0x4eb   : > { %v1678_v5 = vpop.f32.mrf.mxu1 }
 0x4ec   : > { %2851 = vmatmul.msk.f32.gmra.mxu3 %vm1015_vm2, %v1678_v5  ;;  %v1698_v8 = vmul.f32 %v1678_v5, %v3265_v43  ;;  %v1690_v17 = vmul.f32 %v1678_v5, %v3286_v54 }
 0x4f3   : > { %v1681_v6 = vpop.f32.mrf.mxu1 }
 0x4f4   : > { %v1699_v7 = vmul.f32 %v1681_v6, %v3265_v43  ;;  %2852 = vmatmul.msk.f32.gmra.mxu3 %vm1015_vm2, %v1681_v6  ;;  %v1691_v42 = vmul.f32 %v1681_v6, %v3286_v54  ;;  %v1687_v43 = vmul.f32 %v1669_v2, %v3286_v54  ;;  %v1702_v54 = vld [vmem:[%s3704_s15] sm:$0x1] }
 0x4f6   : > { %2828 = vmatpush.xpose.msk.msra.mxu2 %vm1015_vm2, %v1699_v7  ;;  %1969 = vmatpush.msra.mxu0 %v1699_v7 }
 0x4f8   : > { %1970 = vmatpush.msra.mxu0 %v1698_v8 }
 0x4fa   : > { %2829 = vmatpush.xpose.msk.msra.mxu2 %vm1015_vm2, %v1698_v8  ;;  %1971 = vmatpush.msra.mxu0 %v1697_v9 }
 0x4fc   : > { %1972 = vmatpush.msra.mxu0 %v1696_v10 }
 0x4fe   : > { %2830 = vmatpush.xpose.msk.msra.mxu2 %vm1015_vm2, %v1697_v9  ;;  %1973 = vmatpush.msra.mxu0 %v1695_v11 }
 0x500   : > { %1974 = vmatpush.msra.mxu0 %v1694_v12 }
 0x502   : > { %2831 = vmatpush.xpose.msk.msra.mxu2 %vm1015_vm2, %v1696_v10  ;;  %1975 = vmatpush.msra.mxu0 %v1693_v13 }
 0x504   : > { %1976 = vmatpush.msra.mxu0 %v1692_v16 }
 0x506   : > { %2832 = vmatpush.xpose.msk.msra.mxu2 %vm1015_vm2, %v1695_v11  ;;  %1977 = vmatpush.msra.mxu0 %v1691_v42 }
 0x508   : > { %1978 = vmatpush.msra.mxu0 %v1690_v17 }
 0x50a   : > { %2833 = vmatpush.xpose.msk.msra.mxu2 %vm1015_vm2, %v1694_v12  ;;  %1979 = vmatpush.msra.mxu0 %v1689_v27 }
 0x50c   : > { %1980 = vmatpush.msra.mxu0 %v1688_v31 }
 0x50e   : > { %2834 = vmatpush.xpose.msk.msra.mxu2 %vm1015_vm2, %v1693_v13  ;;  %1981 = vmatpush.msra.mxu0 %v1687_v43 }
 0x510   : > { %1982 = vmatpush.msra.mxu0 %v1686_v32 }
 0x512   : > { %2835 = vmatpush.xpose.msk.msra.mxu2 %vm1015_vm2, %v1692_v16  ;;  %1983 = vmatpush.msra.mxu0 %v1685_v35 }
 0x514   : > { %1984 = vmatpush.msra.mxu0 %v1684_v36 }
 0x516   : > { %2836 = vmatpush.xpose.msk.msra.mxu2 %vm1015_vm2, %v1691_v42 }
 0x51a   : > { %2837 = vmatpush.xpose.msk.msra.mxu2 %vm1015_vm2, %v1690_v17 }
 0x51e   : > { %2838 = vmatpush.xpose.msk.msra.mxu2 %vm1015_vm2, %v1689_v27 }
 0x522   : > { %2839 = vmatpush.xpose.msk.msra.mxu2 %vm1015_vm2, %v1688_v31 }
 0x526   : > { %2840 = vmatpush.xpose.msk.msra.mxu2 %vm1015_vm2, %v1687_v43 }
 0x52a   : > { %2841 = vmatpush.xpose.msk.msra.mxu2 %vm1015_vm2, %v1686_v32 }
 0x52e   : > { %2842 = vmatpush.xpose.msk.msra.mxu2 %vm1015_vm2, %v1685_v35 }
 0x532   : > { %2843 = vmatpush.xpose.msk.msra.mxu2 %vm1015_vm2, %v1684_v36 }
 0x535   : > { %2844 = vmatmul.msk.f32.vlgmr.msra.gmra.mxu2 %vm1015_vm2, %v1702_v54 }
 0x536   : > { %1927 = vmatpush.xpose.msrb.mxu2 %v3322_v14 }
 0x53f   : > { %v1816_v26 = vpop.f32.mrf.mxu3 }
 0x547   : > { %v1819_v28 = vpop.f32.mrf.mxu3 }
 0x54f   : > { %v1822_v34 = vpop.f32.mrf.mxu3 }
 0x557   : > { %v1825_v37 = vpop.f32.mrf.mxu3 }
 0x55f   : > { %v1828_v38 = vpop.f32.mrf.mxu3 }
 0x567   : > { %v1831_v18 = vpop.f32.mrf.mxu3 }
 0x56f   : > { %v1834_v19 = vpop.f32.mrf.mxu3 }
 0x577   : > { %v1837_v33 = vpop.f32.mrf.mxu3 }
 0x5b8   : > { %v1771_v40 = vpop.f32.mrf.mxu2 }
 0x5b9   : > { %v1774_v41 = vperm.slane %v1771_v40, 0 }
 0x5bb   : > { %v1823_v45 = vadd.f32 %v1822_v34, %v1774_v41  ;;  %v1820_v47 = vadd.f32 %v1819_v28, %v1774_v41  ;;  %v1817_v48 = vadd.f32 %v1816_v26, %v1774_v41  ;;  %v1832_v20 = vadd.f32 %v1831_v18, %v1774_v41 }
 0x5bc   : > { %v1829_v50 = vadd.f32 %v1828_v38, %v1774_v41  ;;  %v1826_v52 = vadd.f32 %v1825_v37, %v1774_v41  ;;  %v1838_v1 = vadd.f32 %v1837_v33, %v1774_v41 }
 0x5bd   : > { %vm1842_vm12 = vcmp.gt.f32.partialorder %v1823_v45, 0.0  ;;  %v1850_v51 = vmul.f32 0.2, %v1823_v45  ;;  %vm1841_vm13 = vcmp.gt.f32.partialorder %v1820_v47, 0.0  ;;  %v1849_v14 = vmul.f32 0.2, %v1820_v47 }
 0x5be   : > { %vm1840_vm14 = vcmp.gt.f32.partialorder %v1817_v48, 0.0  ;;  %v1848_v24 = vmul.f32 0.2, %v1817_v48  ;;  %v1853_v60 = vmul.f32 0.2, %v1832_v20  ;;  %vm1845_vm15 = vcmp.gt.f32.partialorder %v1832_v20, 0.0 }
 0x5bf   : > { %v1858_v53 = vsel %vm1842_vm12, %v1823_v45, %v1850_v51  ;;  %v1857_v55 = vsel %vm1841_vm13, %v1820_v47, %v1849_v14  ;;  %v1852_v62 = vmul.f32 0.2, %v1829_v50  ;;  %vm1844_vm0 = vcmp.gt.f32.partialorder %v1829_v50, 0.0 }
 0x5c0   : > { %v1866_v25 = vadd.f32 %v1858_v53, %v3329_v23  ;;  %v1865_v56 = vadd.f32 %v1857_v55, %v3347_v49  ;;  %v1856_v57 = vsel %vm1840_vm14, %v1817_v48, %v1848_v24  ;;  %v1851_v63 = vmul.f32 0.2, %v1826_v52 }
 0x5c1   : > { %v1864_v58 = vadd.f32 %v1856_v57, %v3332_v29  ;;  %vm1843_vm1 = vcmp.gt.f32.partialorder %v1826_v52, 0.0  ;;  %v1861_v0 = vsel %vm1845_vm15, %v1832_v20, %v1853_v60  ;;  %v1860_v30 = vsel %vm1844_vm0, %v1829_v50, %v1852_v62 }
 0x5c2   : > { %1876 = vmax.xlane.f32.xlu1 %v1866_v25  ;;  %1874 = vmax.xlane.f32.xlu0 %v1865_v56  ;;  %v1859_v39 = vsel %vm1843_vm1, %v1826_v52, %v1851_v63  ;;  %v1835_v23 = vadd.f32 %v1834_v19, %v1774_v41  ;;  %v1869_v49 = vadd.f32 %v1861_v0, %v3341_v44  ;;  %v1855_v3 = vmul.f32 0.2, %v1838_v1 }
 0x5c3   : > { %1872 = vmax.xlane.f32.xlu2 %v1864_v58  ;;  %v1868_v2 = vadd.f32 %v1860_v30, %v3326_v22  ;;  %v1867_v29 = vadd.f32 %v1859_v39, %v3344_v46  ;;  %vm1847_vm4 = vcmp.gt.f32.partialorder %v1838_v1, 0.0 }
 0x5c4   : > { %v1854_v4 = vmul.f32 0.2, %v1835_v23  ;;  %vm1846_vm5 = vcmp.gt.f32.partialorder %v1835_v23, 0.0  ;;  %v1863_v5 = vsel %vm1847_vm4, %v1838_v1, %v1855_v3 }
 0x5c5   : > { %v1871_v7 = vadd.f32 %v1863_v5, %v3353_v59 }
 0x5c6   : > { %v1862_v6 = vsel %vm1846_vm5, %v1835_v23, %v1854_v4 }
 0x5c7   : > { %v1870_v8 = vadd.f32 %v1862_v6, %v3356_v61 }
 0x5ca   : > { %1882 = vmax.xlane.f32.xlu1 %v1869_v49  ;;  %1880 = vmax.xlane.f32.xlu0 %v1868_v2 }
 0x5cb   : > { %1878 = vmax.xlane.f32.xlu2 %v1867_v29 }
 0x5d2   : > { %1886 = vmax.xlane.f32.xlu0 %v1871_v7 }
 0x5d3   : > { %1884 = vmax.xlane.f32.xlu2 %v1870_v8 }
 0x635   : > { %v1875_v22 = vpop.xlane.xlu0 %1874  ;;  %v1877_v12 = vpop.xlane.xlu1 %1876 }
 0x636   : > { %v1873_v44 = vpop.xlane.xlu2 %1872  ;;  %v1889_v46 = vsub.f32 %v1865_v56, %v1875_v22  ;;  %v1890_v16 = vsub.f32 %v1866_v25, %v1877_v12 }
 0x637   : > { %v1888_v9 = vsub.f32 %v1864_v58, %v1873_v44 }
 0x638   : > { %v1898_v11 = vmul.f32 1.442695, %v1889_v46  ;;  %v1900_v42 = vmul.f32 1.442695, %v1890_v16  ;;  %v2925_v16 = vld [vmem:[%s3705_s16] ss:$0 sm:$0xff] }
 0x639   : > { %v1896_v10 = vmul.f32 1.442695, %v1888_v9 }
 0x63b   : > { %2967 = vpow2.f32 %v1896_v10 }
 0x63c   : > { %2969 = vpow2.f32 %v1898_v11 }
 0x63d   : > { %2971 = vpow2.f32 %v1900_v42  ;;  %v1881_v31 = vpop.xlane.xlu0 %1880  ;;  %v1883_v36 = vpop.xlane.xlu1 %1882 }
 0x63e   : > { %v1879_v17 = vpop.xlane.xlu2 %1878  ;;  %v1892_v32 = vsub.f32 %v1868_v2, %v1881_v31  ;;  %v1893_v26 = vsub.f32 %v1869_v49, %v1883_v36 }
 0x63f   : > { %v1891_v61 = vsub.f32 %v1867_v29, %v1879_v17 }
 0x640   : > { %v1904_v35 = vmul.f32 1.442695, %v1892_v32  ;;  %v1906_v28 = vmul.f32 1.442695, %v1893_v26 }
 0x641   : > { %v2968_v13 = vpop.eup %2967  ;;  %v1902_v27 = vmul.f32 1.442695, %v1891_v61 }
 0x642   : > { %1928 = vmatmul.f32.vlgmr.msrb.gmra.mxu2 %v2968_v13  ;;  %1985 = vmatmul.f32.vlgmr.msra.gmra.mxu0 %v2968_v13  ;;  %v2970_v59 = vpop.eup %2969 }
 0x643   : > { %v2972_v43 = vpop.eup %2971  ;;  %2973 = vpow2.f32 %v1902_v27 }
 0x644   : > { %2975 = vpow2.f32 %v1904_v35 }
 0x645   : > { %2977 = vpow2.f32 %v1906_v28  ;;  %v1887_v40 = vpop.xlane.xlu0 %1886 }
 0x646   : > { %v1885_v34 = vpop.xlane.xlu2 %1884  ;;  %v1895_v19 = vsub.f32 %v1871_v7, %v1887_v40 }
 0x647   : > { %v1894_v38 = vsub.f32 %v1870_v8, %v1885_v34 }
 0x648   : > { %v1910_v45 = vmul.f32 1.442695, %v1895_v19 }
 0x649   : > { %v2974_v54 = vpop.eup %2973  ;;  %v1908_v18 = vmul.f32 1.442695, %v1894_v38 }
 0x64a   : > { %1931 = vmatmul.f32.gmra.mxu2 %v2970_v59  ;;  %1988 = vmatmul.f32.gmra.mxu0 %v2970_v59  ;;  %v2976_v37 = vpop.eup %2975 }
 0x64b   : > { %v2978_v41 = vpop.eup %2977  ;;  %2979 = vpow2.f32 %v1908_v18 }
 0x64c   : > { %2981 = vpow2.f32 %v1910_v45 }
 0x651   : > { %v2980_v47 = vpop.eup %2979 }
 0x652   : > { %1934 = vmatmul.f32.gmra.mxu2 %v2972_v43  ;;  %1991 = vmatmul.f32.gmra.mxu0 %v2972_v43  ;;  %v2982_v48 = vpop.eup %2981 }
 0x65a   : > { %1937 = vmatmul.f32.gmra.mxu2 %v2974_v54  ;;  %1994 = vmatmul.f32.gmra.mxu0 %v2974_v54 }
 0x662   : > { %1940 = vmatmul.f32.gmra.mxu2 %v2976_v37  ;;  %1997 = vmatmul.f32.gmra.mxu0 %v2976_v37 }
 0x66a   : > { %1943 = vmatmul.f32.gmra.mxu2 %v2978_v41  ;;  %2000 = vmatmul.f32.gmra.mxu0 %v2978_v41 }
 0x672   : > { %1946 = vmatmul.f32.gmra.mxu2 %v2980_v47  ;;  %2003 = vmatmul.f32.gmra.mxu0 %v2980_v47 }
 0x67a   : > { %1949 = vmatmul.f32.gmra.mxu2 %v2982_v48  ;;  %2006 = vmatmul.f32.gmra.mxu0 %v2982_v48 }
 0x6bf   : > { %v1986_v3 = vpop.f32.mrf.mxu0 }
 0x6c5   : > { %v1929_v20 = vpop.f32.mrf.mxu2 }
 0x6c6   : > { %v1953_v50 = vmax.f32 %v1929_v20, 1e-20 }
 0x6c7   : > { %v1989_v4 = vpop.f32.mrf.mxu0 }
 0x6c8   : > { %2983 = vrcp.f32 %v1953_v50 }
 0x6cd   : > { %v1932_v51 = vpop.f32.mrf.mxu2 }
 0x6ce   : > { %v2984_v14 = vpop.eup %2983  ;;  %v1954_v24 = vmax.f32 %v1932_v51, 1e-20 }
 0x6cf   : > { %2854 = vmatmul.msk.f32.vlgmr.msra.gmra.mxu1 %vm1409_vm7, %v2984_v14  ;;  %v1992_v6 = vpop.f32.mrf.mxu0 }
 0x6d0   : > { %2985 = vrcp.f32 %v1954_v24 }
 0x6d5   : > { %v1935_v52 = vpop.f32.mrf.mxu2 }
 0x6d6   : > { %v2986_v53 = vpop.eup %2985  ;;  %v1955_v55 = vmax.f32 %v1935_v52, 1e-20 }
 0x6d7   : > { %2855 = vmatmul.msk.f32.gmra.mxu1 %vm1409_vm7, %v2986_v53  ;;  %v1995_v8 = vpop.f32.mrf.mxu0 }
 0x6d8   : > { %2987 = vrcp.f32 %v1955_v55 }
 0x6dd   : > { %v1938_v25 = vpop.f32.mrf.mxu2 }
 0x6de   : > { %v2988_v56 = vpop.eup %2987  ;;  %v1956_v57 = vmax.f32 %v1938_v25, 1e-20 }
 0x6df   : > { %2856 = vmatmul.msk.f32.gmra.mxu1 %vm1409_vm7, %v2988_v56  ;;  %v1998_v22 = vpop.f32.mrf.mxu0 }
 0x6e0   : > { %2989 = vrcp.f32 %v1956_v57 }
 0x6e5   : > { %v1941_v58 = vpop.f32.mrf.mxu2 }
 0x6e6   : > { %v2990_v60 = vpop.eup %2989  ;;  %v1957_v62 = vmax.f32 %v1941_v58, 1e-20 }
 0x6e7   : > { %2857 = vmatmul.msk.f32.gmra.mxu1 %vm1409_vm7, %v2990_v60  ;;  %v2001_v46 = vpop.f32.mrf.mxu0 }
 0x6e8   : > { %2991 = vrcp.f32 %v1957_v62 }
 0x6ed   : > { %v1944_v63 = vpop.f32.mrf.mxu2 }
 0x6ee   : > { %v2992_v33 = vpop.eup %2991  ;;  %v1958_v0 = vmax.f32 %v1944_v63, 1e-20 }
 0x6ef   : > { %2858 = vmatmul.msk.f32.gmra.mxu1 %vm1409_vm7, %v2992_v33  ;;  %v2004_v43 = vpop.f32.mrf.mxu0 }
 0x6f0   : > { %2993 = vrcp.f32 %v1958_v0 }
 0x6f5   : > { %v1947_v30 = vpop.f32.mrf.mxu2 }
 0x6f6   : > { %v2994_v1 = vpop.eup %2993  ;;  %v1959_v39 = vmax.f32 %v1947_v30, 1e-20 }
 0x6f7   : > { %2859 = vmatmul.msk.f32.gmra.mxu1 %vm1409_vm7, %v2994_v1  ;;  %v2007_v20 = vpop.f32.mrf.mxu0 }
 0x6f8   : > { %2995 = vrcp.f32 %v1959_v39 }
 0x6fd   : > { %v1950_v23 = vpop.f32.mrf.mxu2 }
 0x6fe   : > { %v2996_v49 = vpop.eup %2995  ;;  %v1960_v2 = vmax.f32 %v1950_v23, 1e-20 }
 0x6ff   : > { %2860 = vmatmul.msk.f32.gmra.mxu1 %vm1409_vm7, %v2996_v49 }
 0x700   : > { %2997 = vrcp.f32 %v1960_v2 }
 0x706   : > { %v2998_v29 = vpop.eup %2997 }
 0x707   : > { %2861 = vmatmul.msk.f32.gmra.mxu1 %vm1409_vm7, %v2998_v29 }
 0x74c   : > { %v2051_v5 = vpop.f32.mrf.mxu1 }
 0x74d   : > { %v2075_v13 = vmul.f32 %v2051_v5, %v1986_v3 }
 0x74f   : > { %v2087_v61 = vadd.f32 %v2925_v16, %v2075_v13 }
 0x751   : > { %v2095_v26 = vsel %vm1015_vm2, %v2087_v61, 0.0 }
 0x754   : > { %v2054_v7 = vpop.f32.mrf.mxu1 }
 0x755   : > { %v2076_v11 = vmul.f32 %v2054_v7, %v1989_v4 }
 0x757   : > { %v2088_v17 = vadd.f32 %v2925_v16, %v2076_v11 }
 0x759   : > { %v2096_v32 = vsel %vm1015_vm2, %v2088_v17, 0.0 }
 0x75a   : > { %v2097_v38 = vadd.f32 %v2096_v32, %v2095_v26 }
 0x75c   : > { %v2057_v44 = vpop.f32.mrf.mxu1 }
 0x75d   : > { %v2077_v42 = vmul.f32 %v2057_v44, %v1992_v6 }
 0x75f   : > { %v2089_v27 = vadd.f32 %v2925_v16, %v2077_v42 }
 0x761   : > { %v2098_v28 = vsel %vm1015_vm2, %v2089_v27, 0.0 }
 0x762   : > { %v2099_v41 = vadd.f32 %v2098_v28, %v2097_v38  ;;  %v2207_v28 = vld [vmem:[%s3708_s19 + $0x8] sm:$0xff] }
 0x763   : > { %2246 = vmatpush.msrb.mxu3 %v2207_v28 }
 0x764   : > { %v2060_v9 = vpop.f32.mrf.mxu1 }
 0x765   : > { %v2078_v59 = vmul.f32 %v2060_v9, %v1995_v8 }
 0x767   : > { %v2090_v35 = vadd.f32 %v2925_v16, %v2078_v59 }
 0x769   : > { %v2100_v18 = vsel %vm1015_vm2, %v2090_v35, 0.0 }
 0x76a   : > { %v2101_v47 = vadd.f32 %v2100_v18, %v2099_v41 }
 0x76c   : > { %v2063_v10 = vpop.f32.mrf.mxu1 }
 0x76d   : > { %v2079_v31 = vmul.f32 %v2063_v10, %v1998_v22 }
 0x76f   : > { %v2091_v34 = vadd.f32 %v2925_v16, %v2079_v31 }
 0x771   : > { %v2102_v19 = vsel %vm1015_vm2, %v2091_v34, 0.0 }
 0x772   : > { %v2103_v50 = vadd.f32 %v2102_v19, %v2101_v47 }
 0x774   : > { %v2066_v12 = vpop.f32.mrf.mxu1 }
 0x775   : > { %v2080_v36 = vmul.f32 %v2066_v12, %v2001_v46 }
 0x777   : > { %v2092_v40 = vadd.f32 %v2925_v16, %v2080_v36 }
 0x779   : > { %v2104_v48 = vsel %vm1015_vm2, %v2092_v40, 0.0 }
 0x77a   : > { %v2105_v52 = vadd.f32 %v2104_v48, %v2103_v50 }
 0x77c   : > { %v2069_v54 = vpop.f32.mrf.mxu1 }
 0x77d   : > { %v2081_v37 = vmul.f32 %v2069_v54, %v2004_v43 }
 0x77f   : > { %v2093_v45 = vadd.f32 %v2925_v16, %v2081_v37 }
 0x781   : > { %v2106_v14 = vsel %vm1015_vm2, %v2093_v45, 0.0 }
 0x782   : > { %v2107_v55 = vadd.f32 %v2106_v14, %v2105_v52 }
 0x784   : > { %v2072_v51 = vpop.f32.mrf.mxu1 }
 0x785   : > { %v2082_v24 = vmul.f32 %v2072_v51, %v2007_v20  ;;  %v2926_v51 = vld [vmem:[%s3706_s17] ss:$0 sm:$0xff] }
 0x787   : > { %v2094_v53 = vadd.f32 %v2925_v16, %v2082_v24 }
 0x789   : > { %v2108_v25 = vsel %vm1015_vm2, %v2094_v53, 0.0 }
 0x78a   : > { %v2109_v56 = vadd.f32 %v2108_v25, %v2107_v55 }
 0x78c   : > { %v2110_v57 = vrot.slane %v2109_v56, 4 }
 0x78e   : > { %v2111_v58 = vadd.f32 %v2110_v57, %v2109_v56 }
 0x790   : > { %v2112_v60 = vrot.slane %v2111_v58, 2 }
 0x792   : > { %v2113_v62 = vadd.f32 %v2112_v60, %v2111_v58 }
 0x794   : > { %v2114_v63 = vrot.slane %v2113_v62, 1 }
 0x796   : > { %v2115_v33 = vadd.f32 %v2114_v63, %v2113_v62 }
 0x798   : > { %v2116_v0 = vmul.f32 %v2115_v33, %v3382_v15 }
 0x79a   : > { %v2117_v30 = vsub.f32 %v2087_v61, %v2116_v0  ;;  %v2118_v1 = vsub.f32 %v2088_v17, %v2116_v0  ;;  %v2119_v39 = vsub.f32 %v2089_v27, %v2116_v0  ;;  %v3525_v23 = vsub.f32 %v2090_v35, %v2116_v0 }
 0x79b   : > { %v3527_v49 = vsub.f32 %v2091_v34, %v2116_v0  ;;  %v3529_v4 = vsub.f32 %v2092_v40, %v2116_v0  ;;  %v3535_v44 = vsub.f32 %v2093_v45, %v2116_v0  ;;  %v3540_v46 = vsub.f32 %v2094_v53, %v2116_v0  ;;  %v2206_v34 = vld [vmem:[%s3708_s19] sm:$0xff] }
 0x79c   : > { %v2125_v2 = vmul.f32 %v2117_v30, %v2117_v30  ;;  %v2126_v29 = vmul.f32 %v2118_v1, %v2118_v1  ;;  %v2127_v3 = vmul.f32 %v2119_v39, %v2119_v39  ;;  %v2128_v5 = vmul.f32 %v3525_v23, %v3525_v23  ;;  %2247 = vmatpush.msrb.mxu3 %v2206_v34 }
 0x79d   : > { %v2129_v9 = vmul.f32 %v3527_v49, %v3527_v49  ;;  %v2130_v11 = vmul.f32 %v3529_v4, %v3529_v4  ;;  %v2131_v16 = vmul.f32 %v3535_v44, %v3535_v44  ;;  %v2132_v59 = vmul.f32 %v3540_v46, %v3540_v46 }
 0x79e   : > { %v2133_v6 = vsel %vm1015_vm2, %v2125_v2, 0.0  ;;  %v2134_v7 = vsel %vm1015_vm2, %v2126_v29, 0.0  ;;  %v2136_v22 = vsel %vm1015_vm2, %v2127_v3, 0.0  ;;  %v2138_v12 = vsel %vm1015_vm2, %v2128_v5, 0.0 }
 0x79f   : > { %v2135_v8 = vadd.f32 %v2134_v7, %v2133_v6  ;;  %v2140_v42 = vsel %vm1015_vm2, %v2129_v9, 0.0  ;;  %v2142_v61 = vsel %vm1015_vm2, %v2130_v11, 0.0  ;;  %v2144_v31 = vsel %vm1015_vm2, %v2131_v16, 0.0  ;;  %v2928_v16 = vld [vmem:[%s3709_s20] ss:$0 sm:$0xff] }
 0x7a0   : > { %v2146_v32 = vsel %vm1015_vm2, %v2132_v59, 0.0 }
 0x7a1   : > { %v2137_v10 = vadd.f32 %v2136_v22, %v2135_v8 }
 0x7a3   : > { %v2139_v13 = vadd.f32 %v2138_v12, %v2137_v10 }
 0x7a5   : > { %v2141_v17 = vadd.f32 %v2140_v42, %v2139_v13 }
 0x7a7   : > { %v2143_v27 = vadd.f32 %v2142_v61, %v2141_v17 }
 0x7a9   : > { %v2145_v43 = vadd.f32 %v2144_v31, %v2143_v27 }
 0x7ab   : > { %v2147_v35 = vadd.f32 %v2146_v32, %v2145_v43 }
 0x7ad   : > { %v2148_v36 = vrot.slane %v2147_v35, 4 }
 0x7af   : > { %v2149_v54 = vadd.f32 %v2148_v36, %v2147_v35 }
 0x7b1   : > { %v2150_v26 = vrot.slane %v2149_v54, 2 }
 0x7b3   : > { %v2151_v37 = vadd.f32 %v2150_v26, %v2149_v54 }
 0x7b5   : > { %v2152_v38 = vrot.slane %v2151_v37, 1 }
 0x7b7   : > { %v2153_v18 = vadd.f32 %v2152_v38, %v2151_v37 }
 0x7b9   : > { %v2154_v40 = vmul.f32 %v2153_v18, %v3382_v15  ;;  %v2927_v15 = vld [vmem:[%s3707_s18] ss:$0 sm:$0xff] }
 0x7bb   : > { %v2155_v41 = vadd.f32 1e-05, %v2154_v40 }
 0x7bd   : > { %2999 = vrsqrt.f32 %v2155_v41  ;;  %vm2162_vm7 = vweird.f32 %v2155_v41 }
 0x7c3   : > { %v3000_v19 = vpop.eup %2999 }
 0x7c4   : > { %v2157_v45 = vmul.f32 %v3000_v19, %v2155_v41  ;;  %vm2163_vm6 = vweird.f32 %v3000_v19 }
 0x7c5   : > { %vm2164_vm8 = vmor %vm2162_vm7, %vm2163_vm6 }
 0x7c6   : > { %v2158_v47 = vmul.f32 %v3000_v19, %v2157_v45 }
 0x7c8   : > { %v2159_v48 = vmul.f32 0.5, %v2158_v47 }
 0x7ca   : > { %v2160_v20 = vsub.f32 1.5, %v2159_v48  ;;  %v2310_v48 = vld [vmem:[%s3710_s21] sm:$0x1] }
 0x7cc   : > { %v2161_v50 = vmul.f32 %v3000_v19, %v2160_v20 }
 0x7ce   : > { %v2165_v14 = vsel %vm2164_vm8, %v3000_v19, %v2161_v50  ;;  %v787_v50 = vld [vmem:[%s3253_s30 + $0x4] sm:$0xff]  }
 0x7cf   : > { %v2166_v24 = vmul.f32 %v2165_v14, %v2117_v30  ;;  %v2167_v53 = vmul.f32 %v2165_v14, %v2118_v1  ;;  %v2168_v58 = vmul.f32 %v2165_v14, %v2119_v39  ;;  %v2169_v33 = vmul.f32 %v2165_v14, %v3525_v23 }
 0x7d0   : > { %v2170_v1 = vmul.f32 %v2165_v14, %v3527_v49  ;;  %v2171_v39 = vmul.f32 %v2165_v14, %v3529_v4  ;;  %v2172_v23 = vmul.f32 %v2165_v14, %v3535_v44  ;;  %v2173_v49 = vmul.f32 %v2165_v14, %v3540_v46 }
 0x7d1   : > { %v2178_v52 = vmul.f32 %v2926_v51, %v2166_v24  ;;  %v2179_v56 = vmul.f32 %v2926_v51, %v2167_v53  ;;  %v2180_v62 = vmul.f32 %v2926_v51, %v2168_v58  ;;  %v2181_v30 = vmul.f32 %v2926_v51, %v2169_v33  ;;  %v3606_v58 = vld [vmem:[%s3253_s30 + $0x18] sm:$0xff]  }
 0x7d2   : > { %v2182_v3 = vmul.f32 %v2926_v51, %v2170_v1  ;;  %v2183_v7 = vmul.f32 %v2926_v51, %v2171_v39  ;;  %v2184_v22 = vmul.f32 %v2926_v51, %v2172_v23  ;;  %v2185_v11 = vmul.f32 %v2926_v51, %v2173_v49 }
 0x7d3   : > { %v2190_v55 = vadd.f32 %v2927_v15, %v2178_v52  ;;  %v2191_v57 = vadd.f32 %v2927_v15, %v2179_v56  ;;  %v2192_v63 = vadd.f32 %v2927_v15, %v2180_v62  ;;  %v2193_v2 = vadd.f32 %v2927_v15, %v2181_v30  ;;  %v789_v52 = vld [vmem:[%s3253_s30 + $0xc] sm:$0xff]  }
 0x7d4   : > { %v2194_v5 = vadd.f32 %v2927_v15, %v2182_v3  ;;  %v2195_v8 = vadd.f32 %v2927_v15, %v2183_v7  ;;  %v2196_v10 = vadd.f32 %v2927_v15, %v2184_v22  ;;  %v2197_v13 = vadd.f32 %v2927_v15, %v2185_v11  ;;  %v786_v15 = vld [vmem:[%s3253_s30] sm:$0xf] }
 0x7d5   : > { %v2198_v25 = vmax.f32 %v2190_v55, 0.0  ;;  %v2199_v60 = vmax.f32 %v2191_v57, 0.0  ;;  %v2200_v0 = vmax.f32 %v2192_v63, 0.0  ;;  %v2201_v29 = vmax.f32 %v2193_v2, 0.0 }
 0x7d6   : > { %v2202_v6 = vmax.f32 %v2194_v5, 0.0  ;;  %v2203_v9 = vmax.f32 %v2195_v8, 0.0  ;;  %v2204_v12 = vmax.f32 %v2196_v10, 0.0  ;;  %v2205_v4 = vmax.f32 %v2197_v13, 0.0 }
 0x7d7   : > { %2862 = vmatmul.msk.f32.vlgmr.msrb.gmra.mxu3 %vm1015_vm2, %v2198_v25  ;;  %v805_v24 = vunpack.c.l.bf16 %v787_v50  ;;  %v804_v55 = vunpack.c.l.bf16 %v786_v15  ;;  %v807_v25 = vunpack.c.l.bf16 %v789_v52  ;;  %v808_v56 = vunpack.c.h.bf16 %v789_v52 }
 0x7d8   : > { %v806_v57 = vunpack.c.h.bf16 %v787_v50 }
 0x7d9   : > { %vm812_vm10 = vcmp.gt.f32.partialorder %v804_v55, 0.0  ;;  %vm815_vm11 = vcmp.gt.f32.partialorder %v807_v25, 0.0  ;;  %vm3610_vm12 = vcmp.gt.f32.partialorder %v808_v56, 0.0 }
 0x7da   : > { %vm3614_vm13 = vcmp.gt.f32.partialorder %v806_v57, 0.0  ;;  %v820_v23 = vsel %vm812_vm10, 0.0, %v3041_v21  ;;  %v824_v13 = vsel %vm3610_vm12, 0.0, %v3041_v21 }
 0x7df   : > { %2863 = vmatmul.msk.f32.gmra.mxu3 %vm1015_vm2, %v2199_v60  ;;  %v791_v60 = vld [vmem:[%s3253_s30 + $0x14] sm:$0xf] }
 0x7e0   : > { %v809_v3 = vunpack.c.l.bf16 %v791_v60 }
 0x7e2   : > { %vm817_vm7 = vcmp.gt.f32.partialorder %v809_v3, 0.0 }
 0x7e3   : > { %v825_v50 = vsel %vm817_vm7, 0.0, %v3041_v21 }
 0x7e7   : > { %2864 = vmatmul.msk.f32.gmra.mxu3 %vm1015_vm2, %v2200_v0 }
 0x7ef   : > { %2865 = vmatmul.msk.f32.gmra.mxu3 %vm1015_vm2, %v2201_v29  ;;  %v810_v29 = vunpack.c.l.bf16 %v3606_v58 }
 0x7f1   : > { %vm818_vm5 = vcmp.gt.f32.partialorder %v810_v29, 0.0 }
 0x7f7   : > { %2866 = vmatmul.msk.f32.gmra.mxu3 %vm1015_vm2, %v2202_v6 }
 0x7ff   : > { %2867 = vmatmul.msk.f32.gmra.mxu3 %vm1015_vm2, %v2203_v9  ;;  %v823_v9 = vsel %vm815_vm11, 0.0, %v3041_v21  ;;  %vm2601_vm11 = vcmask 1043456  }
 0x807   : > { %2868 = vmatmul.msk.f32.gmra.mxu3 %vm1015_vm2, %v2204_v12 }
 0x80f   : > { %2869 = vmatmul.msk.f32.gmra.mxu3 %vm1015_vm2, %v2205_v4  ;;  %vm813_vm2 = vcmp.gt.f32.partialorder %v805_v24, 0.0 }
 0x810   : > { %v821_v33 = vsel %vm813_vm2, 0.0, %v3041_v21 }
 0x85a   : > { %v2249_v44 = vpop.f32.mrf.mxu3 }
 0x85b   : > { %v2277_v42 = vmul.f32 %v2928_v16, %v2249_v44 }
 0x85d   : > { %v2286_v17 = vsel %vm2285_vm9, %v2277_v42, 0.0 }
 0x85e   : > { %2287 = vadd.xlane.f32.xlu1 %v2286_v17 }
 0x862   : > { %v2252_v46 = vpop.f32.mrf.mxu3 }
 0x863   : > { %v2278_v59 = vmul.f32 %v2928_v16, %v2252_v46 }
 0x865   : > { %v2289_v61 = vsel %vm2285_vm9, %v2278_v59, 0.0 }
 0x866   : > { %2290 = vadd.xlane.f32.xlu2 %v2289_v61 }
 0x86a   : > { %v2255_v27 = vpop.f32.mrf.mxu3 }
 0x86b   : > { %v2279_v31 = vmul.f32 %v2928_v16, %v2255_v27 }
 0x86d   : > { %v2292_v43 = vsel %vm2285_vm9, %v2279_v31, 0.0 }
 0x86e   : > { %2293 = vadd.xlane.f32.xlu0 %v2292_v43 }
 0x872   : > { %v2258_v32 = vpop.f32.mrf.mxu3 }
 0x873   : > { %v2280_v35 = vmul.f32 %v2928_v16, %v2258_v32 }
 0x875   : > { %v2295_v36 = vsel %vm2285_vm9, %v2280_v35, 0.0 }
 0x876   : > { %2296 = vadd.xlane.f32.xlu1 %v2295_v36 }
 0x87a   : > { %v2261_v54 = vpop.f32.mrf.mxu3 }
 0x87b   : > { %v2281_v26 = vmul.f32 %v2928_v16, %v2261_v54 }
 0x87d   : > { %v2298_v28 = vsel %vm2285_vm9, %v2281_v26, 0.0 }
 0x87e   : > { %2299 = vadd.xlane.f32.xlu2 %v2298_v28 }
 0x882   : > { %v2264_v34 = vpop.f32.mrf.mxu3 }
 0x883   : > { %v2282_v37 = vmul.f32 %v2928_v16, %v2264_v34 }
 0x885   : > { %v2301_v38 = vsel %vm2285_vm9, %v2282_v37, 0.0  ;;  %v826_v37 = vsel %vm818_vm5, 0.0, %v3041_v21 }
 0x886   : > { %2302 = vadd.xlane.f32.xlu0 %v2301_v38 }
 0x88a   : > { %v2267_v18 = vpop.f32.mrf.mxu3 }
 0x88b   : > { %v2283_v40 = vmul.f32 %v2928_v16, %v2267_v18 }
 0x88d   : > { %v2304_v41 = vsel %vm2285_vm9, %v2283_v40, 0.0 }
 0x88e   : > { %2305 = vadd.xlane.f32.xlu1 %v2304_v41 }
 0x892   : > { %v2270_v19 = vpop.f32.mrf.mxu3 }
 0x893   : > { %v2284_v45 = vmul.f32 %v2928_v16, %v2270_v19  ;;  %2870 = vmatpush.xpose.msk.msra.mxu2 %vm2285_vm9, %v2270_v19  ;;  %2519 = vmatpush.msrb.mxu0 %v2270_v19 }
 0x895   : > { %2520 = vmatpush.msrb.mxu0 %v2267_v18  ;;  %v2307_v47 = vsel %vm2285_vm9, %v2284_v45, 0.0 }
 0x896   : > { %2308 = vadd.xlane.f32.xlu0 %v2307_v47 }
 0x897   : > { %2871 = vmatpush.xpose.msk.msra.mxu2 %vm2285_vm9, %v2267_v18  ;;  %2521 = vmatpush.msrb.mxu0 %v2264_v34  ;;  %v811_v18 = vunpack.c.h.bf16 %v3606_v58 }
 0x899   : > { %2522 = vmatpush.msrb.mxu0 %v2261_v54  ;;  %vm819_vm2 = vcmp.gt.f32.partialorder %v811_v18, 0.0 }
 0x89a   : > { %v827_v24 = vsel %vm819_vm2, 0.0, %v3041_v21 }
 0x89b   : > { %2872 = vmatpush.xpose.msk.msra.mxu2 %vm2285_vm9, %v2264_v34  ;;  %2523 = vmatpush.msrb.mxu0 %v2258_v32 }
 0x89d   : > { %2524 = vmatpush.msrb.mxu0 %v2255_v27 }
 0x89f   : > { %2873 = vmatpush.xpose.msk.msra.mxu2 %vm2285_vm9, %v2261_v54  ;;  %2525 = vmatpush.msrb.mxu0 %v2252_v46 }
 0x8a1   : > { %2526 = vmatpush.msrb.mxu0 %v2249_v44 }
 0x8a3   : > { %2874 = vmatpush.xpose.msk.msra.mxu2 %vm2285_vm9, %v2258_v32 }
 0x8a7   : > { %2875 = vmatpush.xpose.msk.msra.mxu2 %vm2285_vm9, %v2255_v27  ;;  %v822_v27 = vsel %vm3614_vm13, 0.0, %v3041_v21 }
 0x8ab   : > { %2876 = vmatpush.xpose.msk.msra.mxu2 %vm2285_vm9, %v2252_v46 }
 0x8af   : > { %2877 = vmatpush.xpose.msk.msra.mxu2 %vm2285_vm9, %v2249_v44 }
 0x8b2   : > { %2878 = vmatmul.msk.f32.vlgmr.msra.gmra.mxu2 %vm2285_vm9, %v2310_v48 }
 0x8d1   : > { %v2288_v20 = vpop.xlane.xlu1 %2287 }
 0x8d9   : > { %v2291_v51 = vpop.xlane.xlu2 %2290 }
 0x8e1   : > { %v2294_v14 = vpop.xlane.xlu0 %2293 }
 0x8e9   : > { %v2297_v53 = vpop.xlane.xlu1 %2296 }
 0x8f1   : > { %v2300_v0 = vpop.xlane.xlu2 %2299 }
 0x8f9   : > { %v2303_v30 = vpop.xlane.xlu0 %2302 }
 0x901   : > { %v2306_v5 = vpop.xlane.xlu1 %2305 }
 0x909   : > { %v2309_v31 = vpop.xlane.xlu0 %2308 }
 0x935   : > { %v2355_v62 = vpop.f32.mrf.mxu2 }
 0x936   : > { %v2358_v63 = vperm.slane %v2355_v62, 0 }
 0x938   : > { %v2360_v39 = vadd.f32 %v2358_v63, %v2291_v51  ;;  %v2359_v6 = vadd.f32 %v2358_v63, %v2288_v20  ;;  %v2362_v7 = vadd.f32 %v2358_v63, %v2297_v53  ;;  %v2363_v8 = vadd.f32 %v2358_v63, %v2300_v0 }
 0x939   : > { %v2361_v22 = vadd.f32 %v2358_v63, %v2294_v14  ;;  %v2365_v49 = vadd.f32 %v2358_v63, %v2306_v5  ;;  %v2364_v36 = vadd.f32 %v2358_v63, %v2303_v30  ;;  %v2366_v34 = vadd.f32 %v2358_v63, %v2309_v31 }
 0x93a   : > { %vm2368_vm14 = vcmp.gt.f32.partialorder %v2360_v39, 0.0  ;;  %v2376_v10 = vmul.f32 0.2, %v2360_v39  ;;  %vm2367_vm15 = vcmp.gt.f32.partialorder %v2359_v6, 0.0  ;;  %v2375_v11 = vmul.f32 0.2, %v2359_v6 }
 0x93b   : > { %vm2370_vm0 = vcmp.gt.f32.partialorder %v2362_v7, 0.0  ;;  %v2378_v12 = vmul.f32 0.2, %v2362_v7  ;;  %vm2371_vm1 = vcmp.gt.f32.partialorder %v2363_v8, 0.0  ;;  %v2379_v44 = vmul.f32 0.2, %v2363_v8 }
 0x93c   : > { %v2384_v4 = vsel %vm2368_vm14, %v2360_v39, %v2376_v10  ;;  %v2383_v16 = vsel %vm2367_vm15, %v2359_v6, %v2375_v11  ;;  %v2377_v42 = vmul.f32 0.2, %v2361_v22  ;;  %vm2369_vm4 = vcmp.gt.f32.partialorder %v2361_v22, 0.0 }
 0x93d   : > { %v2392_v17 = vadd.f32 %v2384_v4, %v821_v33  ;;  %v2391_v46 = vadd.f32 %v2383_v16, %v820_v23  ;;  %v2386_v59 = vsel %vm2370_vm0, %v2362_v7, %v2378_v12  ;;  %vm2373_vm6 = vcmp.gt.f32.partialorder %v2365_v49, 0.0 }
 0x93e   : > { %v2394_v61 = vadd.f32 %v2386_v59, %v823_v9  ;;  %v2381_v35 = vmul.f32 0.2, %v2365_v49  ;;  %v2387_v26 = vsel %vm2371_vm1, %v2363_v8, %v2379_v44  ;;  %v2385_v28 = vsel %vm2369_vm4, %v2361_v22, %v2377_v42 }
 0x93f   : > { %v2402_v43 = vsel %vm872_vm3, %v2392_v17, -inf  ;;  %v2399_v32 = vsel %vm872_vm3, %v2391_v46, -inf  ;;  %v2395_v40 = vadd.f32 %v2387_v26, %v824_v13  ;;  %v2393_v41 = vadd.f32 %v2385_v28, %v822_v27 }
 0x940   : > { %2403 = vmax.xlane.f32.xlu1 %v2402_v43  ;;  %2400 = vmax.xlane.f32.xlu2 %v2399_v32  ;;  %v2408_v54 = vsel %vm872_vm3, %v2394_v61, -inf  ;;  %v2389_v38 = vsel %vm2373_vm6, %v2365_v49, %v2381_v35  ;;  %v2380_v45 = vmul.f32 0.2, %v2364_v36  ;;  %v2382_v47 = vmul.f32 0.2, %v2366_v34 }
 0x941   : > { %2409 = vmax.xlane.f32.xlu0 %v2408_v54  ;;  %v2397_v19 = vadd.f32 %v2389_v38, %v826_v37  ;;  %vm2372_vm8 = vcmp.gt.f32.partialorder %v2364_v36, 0.0  ;;  %vm2374_vm10 = vcmp.gt.f32.partialorder %v2366_v34, 0.0  ;;  %v2411_v48 = vsel %vm872_vm3, %v2395_v40, -inf  ;;  %v2929_v37 = vld [vmem:[%s3711_s22] ss:$0 sm:$0xff] }
 0x942   : > { %v2405_v20 = vsel %vm872_vm3, %v2393_v41, -inf  ;;  %v2388_v14 = vsel %vm2372_vm8, %v2364_v36, %v2380_v45  ;;  %v2390_v15 = vsel %vm2374_vm10, %v2366_v34, %v2382_v47  ;;  %v2572_v36 = vld [vmem:[%s3712_s23] sm:$0xf] }
 0x943   : > { %v2417_v51 = vsel %vm872_vm3, %v2397_v19, -inf  ;;  %v2396_v52 = vadd.f32 %v2388_v14, %v825_v50  ;;  %v2398_v53 = vadd.f32 %v2390_v15, %v827_v24  ;;  %2887 = vmatpush.msk.msrb.mxu2 %vm2601_vm11, %v2572_v36 }
 0x945   : > { %v2414_v55 = vsel %vm872_vm3, %v2396_v52, -inf  ;;  %v2420_v25 = vsel %vm872_vm3, %v2398_v53, -inf }
 0x948   : > { %2412 = vmax.xlane.f32.xlu1 %v2411_v48  ;;  %2406 = vmax.xlane.f32.xlu2 %v2405_v20 }
 0x949   : > { %2418 = vmax.xlane.f32.xlu0 %v2417_v51 }
 0x950   : > { %2415 = vmax.xlane.f32.xlu2 %v2414_v55  ;;  %2421 = vmax.xlane.f32.xlu1 %v2420_v25 }
 0x9b3   : > { %v2404_v56 = vpop.xlane.xlu1 %2403  ;;  %v2401_v57 = vpop.xlane.xlu2 %2400 }
 0x9b4   : > { %v2424_v58 = vsub.f32 %v2392_v17, %v2404_v56  ;;  %v2423_v60 = vsub.f32 %v2391_v46, %v2401_v57  ;;  %v2410_v62 = vpop.xlane.xlu0 %2409 }
 0x9b5   : > { %v2426_v0 = vsub.f32 %v2394_v61, %v2410_v62 }
 0x9b6   : > { %v2433_v63 = vmul.f32 1.442695, %v2424_v58  ;;  %v2431_v33 = vmul.f32 1.442695, %v2423_v60 }
 0x9b7   : > { %v2437_v21 = vmul.f32 1.442695, %v2426_v0 }
 0x9b8   : > { %3001 = vpow2.f32 %v2433_v63 }
 0x9b9   : > { %3003 = vpow2.f32 %v2431_v33 }
 0x9ba   : > { %3005 = vpow2.f32 %v2437_v21 }
 0x9bb   : > { %v2413_v30 = vpop.xlane.xlu1 %2412  ;;  %v2407_v2 = vpop.xlane.xlu2 %2406 }
 0x9bc   : > { %v2427_v1 = vsub.f32 %v2395_v40, %v2413_v30  ;;  %v2425_v29 = vsub.f32 %v2393_v41, %v2407_v2  ;;  %v2419_v3 = vpop.xlane.xlu0 %2418 }
 0x9bd   : > { %v2429_v8 = vsub.f32 %v2397_v19, %v2419_v3 }
 0x9be   : > { %v3002_v5 = vpop.eup %3001  ;;  %v2439_v39 = vmul.f32 1.442695, %v2427_v1  ;;  %v2435_v6 = vmul.f32 1.442695, %v2425_v29 }
 0x9bf   : > { %v3004_v7 = vpop.eup %3003  ;;  %v2450_v23 = vsel %vm872_vm3, %v3002_v5, 0.0  ;;  %v2443_v22 = vmul.f32 1.442695, %v2429_v8 }
 0x9c0   : > { %3007 = vpow2.f32 %v2439_v39  ;;  %2879 = vmatmul.msk.f32.vlgmr.msrb.gmra.mxu0 %vm872_vm3, %v3004_v7  ;;  %v2447_v9 = vsel %vm872_vm3, %v3004_v7, 0.0  ;;  %2451 = vadd.xlane.f32.xlu0 %v2450_v23  ;;  %v3006_v13 = vpop.eup %3005 }
 0x9c1   : > { %3009 = vpow2.f32 %v2435_v6  ;;  %2448 = vadd.xlane.f32.xlu2 %v2447_v9  ;;  %v2456_v59 = vsel %vm872_vm3, %v3006_v13, 0.0 }
 0x9c2   : > { %3011 = vpow2.f32 %v2443_v22 }
 0x9c3   : > { %v2416_v49 = vpop.xlane.xlu2 %2415  ;;  %v2422_v10 = vpop.xlane.xlu1 %2421 }
 0x9c4   : > { %v2428_v11 = vsub.f32 %v2396_v52, %v2416_v49  ;;  %v2430_v12 = vsub.f32 %v2398_v53, %v2422_v10 }
 0x9c6   : > { %v3008_v4 = vpop.eup %3007  ;;  %v2441_v16 = vmul.f32 1.442695, %v2428_v11  ;;  %v2445_v44 = vmul.f32 1.442695, %v2430_v12 }
 0x9c7   : > { %v3010_v42 = vpop.eup %3009  ;;  %v2459_v17 = vsel %vm872_vm3, %v3008_v4, 0.0 }
 0x9c8   : > { %3013 = vpow2.f32 %v2441_v16  ;;  %2880 = vmatmul.msk.f32.gmra.mxu0 %vm872_vm3, %v3002_v5  ;;  %2460 = vadd.xlane.f32.xlu0 %v2459_v17  ;;  %v2453_v46 = vsel %vm872_vm3, %v3010_v42, 0.0  ;;  %v3012_v61 = vpop.eup %3011 }
 0x9c9   : > { %3015 = vpow2.f32 %v2445_v44  ;;  %2454 = vadd.xlane.f32.xlu1 %v2453_v46  ;;  %2457 = vadd.xlane.f32.xlu2 %v2456_v59  ;;  %v2465_v35 = vsel %vm872_vm3, %v3012_v61, 0.0 }
 0x9ce   : > { %v3014_v27 = vpop.eup %3013 }
 0x9cf   : > { %v3016_v31 = vpop.eup %3015  ;;  %v2462_v43 = vsel %vm872_vm3, %v3014_v27, 0.0 }
 0x9d0   : > { %2881 = vmatmul.msk.f32.gmra.mxu0 %vm872_vm3, %v3010_v42  ;;  %v2468_v32 = vsel %vm872_vm3, %v3016_v31, 0.0 }
 0x9d1   : > { %2463 = vadd.xlane.f32.xlu1 %v2462_v43  ;;  %2469 = vadd.xlane.f32.xlu0 %v2468_v32 }
 0x9d2   : > { %2466 = vadd.xlane.f32.xlu2 %v2465_v35 }
 0x9d8   : > { %2882 = vmatmul.msk.f32.gmra.mxu0 %vm872_vm3, %v3006_v13  ;;  %v2930_v13 = vld [vmem:[%s3713_s24] ss:$0 sm:$0xff] }
 0x9e0   : > { %2883 = vmatmul.msk.f32.gmra.mxu0 %vm872_vm3, %v3008_v4 }
 0x9e8   : > { %2884 = vmatmul.msk.f32.gmra.mxu0 %vm872_vm3, %v3014_v27 }
 0x9f0   : > { %2885 = vmatmul.msk.f32.gmra.mxu0 %vm872_vm3, %v3012_v61 }
 0x9f8   : > { %2886 = vmatmul.msk.f32.gmra.mxu0 %vm872_vm3, %v3016_v31  ;;  %vm2646_vm3 = vcmask 23552  }
 0xa33   : > { %v2452_v28 = vpop.xlane.xlu0 %2451 }
 0xa34   : > { %v2449_v54 = vpop.xlane.xlu2 %2448  ;;  %v2472_v34 = vmax.f32 %v2452_v28, 1e-20 }
 0xa35   : > { %v2471_v26 = vmax.f32 %v2449_v54, 1e-20 }
 0xa37   : > { %3017 = vrcp.f32 %v2471_v26 }
 0xa38   : > { %3019 = vrcp.f32 %v2472_v34 }
 0xa3b   : > { %v2461_v53 = vpop.xlane.xlu0 %2460 }
 0xa3c   : > { %v2455_v41 = vpop.xlane.xlu1 %2454  ;;  %v2458_v50 = vpop.xlane.xlu2 %2457  ;;  %v2475_v25 = vmax.f32 %v2461_v53, 1e-20 }
 0xa3d   : > { %v3018_v38 = vpop.eup %3017  ;;  %v2528_v18 = vpop.f32.mrf.mxu0  ;;  %v2473_v45 = vmax.f32 %v2455_v41, 1e-20  ;;  %v2474_v14 = vmax.f32 %v2458_v50, 1e-20 }
 0xa3e   : > { %v2552_v40 = vmul.f32 %v3018_v38, %v2528_v18  ;;  %v3020_v47 = vpop.eup %3019 }
 0xa3f   : > { %3021 = vrcp.f32 %v2473_v45 }
 0xa40   : > { %v2564_v19 = vadd.f32 %v2929_v37, %v2552_v40  ;;  %3023 = vrcp.f32 %v2474_v14 }
 0xa41   : > { %3025 = vrcp.f32 %v2475_v25 }
 0xa42   : > { %2888 = vmatmul.msk.f32.vlgmr.msrb.gmra.mxu2 %vm2285_vm9, %v2564_v19 }
 0xa44   : > { %v2464_v60 = vpop.xlane.xlu1 %2463  ;;  %v2470_v39 = vpop.xlane.xlu0 %2469 }
 0xa45   : > { %v2531_v48 = vpop.f32.mrf.mxu0  ;;  %v3022_v24 = vpop.eup %3021  ;;  %v2476_v63 = vmax.f32 %v2464_v60, 1e-20  ;;  %v2478_v7 = vmax.f32 %v2470_v39, 1e-20 }
 0xa46   : > { %v2553_v20 = vmul.f32 %v3020_v47, %v2531_v48  ;;  %v3024_v56 = vpop.eup %3023  ;;  %v2467_v30 = vpop.xlane.xlu2 %2466 }
 0xa47   : > { %v3026_v33 = vpop.eup %3025  ;;  %3027 = vrcp.f32 %v2476_v63  ;;  %v2477_v1 = vmax.f32 %v2467_v30, 1e-20 }
 0xa48   : > { %v2565_v51 = vadd.f32 %v2929_v37, %v2553_v20 }
 0xa49   : > { %3029 = vrcp.f32 %v2477_v1 }
 0xa4a   : > { %2889 = vmatmul.msk.f32.gmra.mxu2 %vm2285_vm9, %v2565_v51  ;;  %3031 = vrcp.f32 %v2478_v7 }
 0xa4d   : > { %v2534_v15 = vpop.f32.mrf.mxu0  ;;  %v3028_v29 = vpop.eup %3027 }
 0xa4e   : > { %v2554_v52 = vmul.f32 %v3022_v24, %v2534_v15 }
 0xa4f   : > { %v3030_v8 = vpop.eup %3029 }
 0xa50   : > { %v2566_v55 = vadd.f32 %v2929_v37, %v2554_v52  ;;  %v3032_v49 = vpop.eup %3031 }
 0xa52   : > { %2890 = vmatmul.msk.f32.gmra.mxu2 %vm2285_vm9, %v2566_v55 }
 0xa55   : > { %v2537_v57 = vpop.f32.mrf.mxu0 }
 0xa56   : > { %v2555_v58 = vmul.f32 %v3024_v56, %v2537_v57 }
 0xa58   : > { %v2567_v62 = vadd.f32 %v2929_v37, %v2555_v58 }
 0xa5a   : > { %2891 = vmatmul.msk.f32.gmra.mxu2 %vm2285_vm9, %v2567_v62 }
 0xa5d   : > { %v2540_v0 = vpop.f32.mrf.mxu0 }
 0xa5e   : > { %v2556_v21 = vmul.f32 %v3026_v33, %v2540_v0 }
 0xa60   : > { %v2568_v2 = vadd.f32 %v2929_v37, %v2556_v21 }
 0xa62   : > { %2892 = vmatmul.msk.f32.gmra.mxu2 %vm2285_vm9, %v2568_v2 }
 0xa65   : > { %v2543_v3 = vpop.f32.mrf.mxu0 }
 0xa66   : > { %v2557_v5 = vmul.f32 %v3028_v29, %v2543_v3 }
 0xa68   : > { %v2569_v6 = vadd.f32 %v2929_v37, %v2557_v5 }
 0xa6a   : > { %2893 = vmatmul.msk.f32.gmra.mxu2 %vm2285_vm9, %v2569_v6 }
 0xa6d   : > { %v2546_v23 = vpop.f32.mrf.mxu0 }
 0xa6e   : > { %v2558_v9 = vmul.f32 %v3030_v8, %v2546_v23 }
 0xa70   : > { %v2570_v22 = vadd.f32 %v2929_v37, %v2558_v9 }
 0xa72   : > { %2894 = vmatmul.msk.f32.gmra.mxu2 %vm2285_vm9, %v2570_v22 }
 0xa75   : > { %v2549_v10 = vpop.f32.mrf.mxu0 }
 0xa76   : > { %v2559_v11 = vmul.f32 %v3032_v49, %v2549_v10 }
 0xa78   : > { %v2571_v12 = vadd.f32 %v2929_v37, %v2559_v11 }
 0xa7a   : > { %2895 = vmatmul.msk.f32.gmra.mxu2 %vm2285_vm9, %v2571_v12 }
 0xac5   : > { %v2622_v4 = vpop.f32.mrf.mxu2 }
 0xac6   : > { %v2623_v16 = vadd.f32 %v2930_v13, %v2622_v4 }
 0xac8   : > { %2647 = vst.msk [vmem:[%s784_s5] sm:$0xff] %vm2646_vm3, %v2623_v16 }
 0xacd   : > { %v2625_v44 = vpop.f32.mrf.mxu2 }
 0xace   : > { %v2626_v42 = vadd.f32 %v2930_v13, %v2625_v44 }
 0xad0   : > { %2648 = vst.msk [vmem:[%s784_s5 + $0x8] sm:$0xff] %vm2646_vm3, %v2626_v42 }
 0xad5   : > { %v2628_v17 = vpop.f32.mrf.mxu2 }
 0xad6   : > { %v2629_v46 = vadd.f32 %v2930_v13, %v2628_v17 }
 0xad8   : > { %2649 = vst.msk [vmem:[%s784_s5 + $0x10] sm:$0xff] %vm2646_vm3, %v2629_v46 }
 0xadd   : > { %v2631_v59 = vpop.f32.mrf.mxu2 }
 0xade   : > { %v2632_v61 = vadd.f32 %v2930_v13, %v2631_v59 }
 0xae0   : > { %2650 = vst.msk [vmem:[%s784_s5 + $0x18] sm:$0xff] %vm2646_vm3, %v2632_v61 }
 0xae5   : > { %v2634_v27 = vpop.f32.mrf.mxu2 }
 0xae6   : > { %v2635_v31 = vadd.f32 %v2930_v13, %v2634_v27 }
 0xae8   : > { %2651 = vst.msk [vmem:[%s784_s5 + $0x20] sm:$0xff] %vm2646_vm3, %v2635_v31 }
 0xaed   : > { %v2637_v43 = vpop.f32.mrf.mxu2 }
 0xaee   : > { %v2638_v32 = vadd.f32 %v2930_v13, %v2637_v43 }
 0xaf0   : > { %2652 = vst.msk [vmem:[%s784_s5 + $0x28] sm:$0xff] %vm2646_vm3, %v2638_v32 }
 0xaf5   : > { %v2640_v35 = vpop.f32.mrf.mxu2 }
 0xaf6   : > { %v2641_v36 = vadd.f32 %v2930_v13, %v2640_v35 }
 0xaf8   : > { %2653 = vst.msk [vmem:[%s784_s5 + $0x30] sm:$0xff] %vm2646_vm3, %v2641_v36 }
 0xafd   : > { %v2643_v54 = vpop.f32.mrf.mxu2 }
 0xafe   : > { %v2644_v26 = vadd.f32 %v2930_v13, %v2643_v54 }
 0xb00   : > { %2654 = vst.msk [vmem:[%s784_s5 + $0x38] sm:$0xff] %vm2646_vm3, %v2644_v26 }
 0xb01 PF: > { %s35_s29 = sadd.s32 1, %s3039_s29  }
 0xb02   : > { %p32_p4 = scmp.ge.s32.totalorder %s35_s29, 10  }
 0xb04   :  { %34 = sbr.rel (!%p32_p4) target bundleno = 11 (0xb), region = 153 }

</bundles_post_ra>
